<compile_context>
chip_gen: v7x
topology: tpu7x:2x2x1
jax: 0.10.0
libtpu: 0.0.40
codegen_flags: <defaults>
</compile_context>

<pallas_src>
import functools

import jax
import jax.numpy as jnp
from jax import lax
from jax.experimental import pallas as pl
from jax.experimental.pallas import tpu as pltpu


# ----------------------------------------------------------------------------
# Helpers
# ----------------------------------------------------------------------------
def _round_up(x, m):
    return (x + m - 1) // m * m


def _pick_m_tile(m_padded):
    """Largest multiple of 128 that divides m_padded and is <= 512."""
    q = m_padded // 128
    for d in (4, 3, 2, 1):
        if q % d == 0:
            return d * 128
    return 128


# ----------------------------------------------------------------------------
# Fused conv + bias + 2x2 max-pool + ReLU
# ----------------------------------------------------------------------------
def _conv_pool_kernel(w_ref, b_ref, p00_ref, p01_ref, p10_ref, p11_ref, o_ref):
    # w: (Cout, Cin*K*K)  patches: (Cin*K*K, TM)  out: (Cout, TM) lane-dense.
    w = w_ref[...]
    m = jnp.dot(w, p00_ref[...], preferred_element_type=jnp.float32)
    for p_ref in (p01_ref, p10_ref, p11_ref):
        m = jnp.maximum(m, jnp.dot(w, p_ref[...],
                                   preferred_element_type=jnp.float32))
    m = m + b_ref[...]                      # (Cout, 1) broadcasts over lanes
    o_ref[...] = jnp.maximum(m, 0.0).astype(o_ref.dtype)


def _pool_patches(x, K):
    """x: (Cin, N, H, W) -> four im2col patch matrices, one per position of the
    2x2 pool window, each (Cin*K*K, N*Hp*Wp).  Row order is (ci, kh, kw) to
    match PyTorch's weight.reshape(Cout, Cin*K*K)."""
    Cin, N, H, W = x.shape
    Ho, Wo = H - K + 1, W - K + 1
    Hp, Wp = Ho // 2, Wo // 2
    mats = []
    for qh in range(2):
        for qw in range(2):
            cols = []
            for kh in range(K):
                for kw in range(K):
                    r0, c0 = qh + kh, qw + kw
                    cols.append(x[:, :,
                                  r0:r0 + 2 * (Hp - 1) + 1:2,
                                  c0:c0 + 2 * (Wp - 1) + 1:2])   # (Cin, N, Hp, Wp)
            p = jnp.stack(cols, axis=1)                          # (Cin, K*K, N, Hp, Wp)
            mats.append(p.reshape(Cin * K * K, N * Hp * Wp))
    return mats, (N, Hp, Wp)


def conv_pool_relu(x, w, b, *, compute_dtype):
    """relu(max_pool2d(conv2d(x) + b, 2)), fully fused in one Pallas kernel.

    x: (Cin, N, H, W) channel-major;  w: (Cout, Cin, K, K) (PyTorch OIHW);
    returns (Cout, N, Hp, Wp).  Bias+pool commute (per-channel constant) and
    relu/max commute, so relu(max_q(W@P_q) + b) == relu(maxpool(conv(x)+b))."""
    Cout, Cin, K, _ = w.shape
    mats, (N, Hp, Wp) = _pool_patches(x, K)
    CKK = Cin * K * K
    M = N * Hp * Wp
    Mp = _round_up(M, 128)
    TM = _pick_m_tile(Mp)

    mats = [jnp.pad(pm, ((0, 0), (0, Mp - M))).astype(compute_dtype) for pm in mats]
    w2d = w.reshape(Cout, CKK).astype(compute_dtype)
    b2d = b.reshape(Cout, 1).astype(jnp.float32)

    isz = jnp.dtype(compute_dtype).itemsize
    cost = pl.CostEstimate(
        flops=int(2 * 4 * Cout * CKK * Mp),
        transcendentals=0,
        bytes_accessed=int(4 * CKK * Mp * isz + Cout * CKK * isz + Cout * Mp * 4),
    )

    out = pl.pallas_call(
        _conv_pool_kernel,
        out_shape=jax.ShapeDtypeStruct((Cout, Mp), jnp.float32),
        grid=(Mp // TM,),
        in_specs=[
            pl.BlockSpec((Cout, CKK), lambda i: (0, 0)),   # weights: resident
            pl.BlockSpec((Cout, 1), lambda i: (0, 0)),     # bias: resident
            pl.BlockSpec((CKK, TM), lambda i: (0, i)),
            pl.BlockSpec((CKK, TM), lambda i: (0, i)),
            pl.BlockSpec((CKK, TM), lambda i: (0, i)),
            pl.BlockSpec((CKK, TM), lambda i: (0, i)),
        ],
        out_specs=pl.BlockSpec((Cout, TM), lambda i: (0, i)),
        compiler_params=pltpu.CompilerParams(
            dimension_semantics=("parallel",),
            vmem_limit_bytes=32 * 1024 * 1024,
        ),
        cost_estimate=cost,
    )(w2d, b2d, *mats)

    return out[:, :M].reshape(Cout, N, Hp, Wp)


# ----------------------------------------------------------------------------
# Fused fc1 + ReLU + fc2 + log_softmax
# ----------------------------------------------------------------------------
def _fc_head_kernel(x_ref, w1_ref, b1_ref, w2_ref, b2_ref, o_ref):
    h = jnp.dot(x_ref[...], w1_ref[...], preferred_element_type=jnp.float32)
    h = jnp.maximum(h + b1_ref[...], 0.0)                 # (TM, 50) stays on-chip
    z = jnp.dot(h, w2_ref[...], preferred_element_type=jnp.float32) + b2_ref[...]
    zmax = jnp.max(z, axis=-1, keepdims=True)
    s = z - zmax
    lse = jnp.log(jnp.sum(jnp.exp(s), axis=-1, keepdims=True))
    o_ref[...] = (s - lse).astype(o_ref.dtype)


def fc_head(x, w1, b1, w2, b2, *, compute_dtype):
    """log_softmax(relu(x @ w1.T + b1) @ w2.T + b2), fused.  x: (N, 320)."""
    N, K1 = x.shape
    H = w1.shape[0]
    C = w2.shape[0]
    TM = min(256, _round_up(N, 8))
    Np = _round_up(N, TM)

    xp = jnp.pad(x, ((0, Np - N), (0, 0))).astype(compute_dtype)
    w1t = w1.T.astype(compute_dtype)                      # (320, 50)
    w2t = w2.T.astype(jnp.float32)                        # (50, 10): tiny, keep f32
    b1r = b1.reshape(1, H).astype(jnp.float32)
    b2r = b2.reshape(1, C).astype(jnp.float32)

    isz = jnp.dtype(compute_dtype).itemsize
    cost = pl.CostEstimate(
        flops=int(2 * Np * (K1 * H + H * C)),
        transcendentals=int(Np * C),
        bytes_accessed=int(Np * K1 * isz + K1 * H * isz + H * C * 4 + Np * C * 4),
    )

    out = pl.pallas_call(
        _fc_head_kernel,
        out_shape=jax.ShapeDtypeStruct((Np, C), jnp.float32),
        grid=(Np // TM,),
        in_specs=[
            pl.BlockSpec((TM, K1), lambda i: (i, 0)),
            pl.BlockSpec((K1, H), lambda i: (0, 0)),
            pl.BlockSpec((1, H), lambda i: (0, 0)),
            pl.BlockSpec((H, C), lambda i: (0, 0)),
            pl.BlockSpec((1, C), lambda i: (0, 0)),
        ],
        out_specs=pl.BlockSpec((TM, C), lambda i: (i, 0)),
        compiler_params=pltpu.CompilerParams(
            dimension_semantics=("parallel",),
            vmem_limit_bytes=32 * 1024 * 1024,
        ),
        cost_estimate=cost,
    )(xp, w1t, b1r, w2t, b2r)
    return out[:N]


# ----------------------------------------------------------------------------
# Full forward pass
# ----------------------------------------------------------------------------
def net_forward(params, x, compute_dtype=jnp.bfloat16):
    """Forward of the PyTorch Net (eval mode).  x: (N, 1, 28, 28) NCHW."""
    N = x.shape[0]
    xc = jnp.transpose(x, (1, 0, 2, 3))                      # (1, N, 28, 28)
    h1 = conv_pool_relu(xc, params["conv1_w"], params["conv1_b"],
                        compute_dtype=compute_dtype)         # (10, N, 12, 12)
    # conv2_drop (Dropout2d) and F.dropout are identity in eval mode.
    h2 = conv_pool_relu(h1, params["conv2_w"], params["conv2_b"],
                        compute_dtype=compute_dtype)         # (20, N, 4, 4)
    feat = jnp.transpose(h2, (1, 0, 2, 3)).reshape(N, 320)   # PyTorch (c,h,w) flatten
    return fc_head(feat, params["fc1_w"], params["fc1_b"],
                   params["fc2_w"], params["fc2_b"],
                   compute_dtype=compute_dtype)              # (N, 10) log-probs


def init_params(key):
    ks = jax.random.split(key, 8)
    s = 0.1
    return {
        "conv1_w": jax.random.normal(ks[0], (10, 1, 5, 5), jnp.float32) * s,
        "conv1_b": jax.random.normal(ks[1], (10,), jnp.float32) * s,
        "conv2_w": jax.random.normal(ks[2], (20, 10, 5, 5), jnp.float32) * s,
        "conv2_b": jax.random.normal(ks[3], (20,), jnp.float32) * s,
        "fc1_w": jax.random.normal(ks[4], (50, 320), jnp.float32) * s,   # PyTorch (out, in)
        "fc1_b": jax.random.normal(ks[5], (50,), jnp.float32) * s,
        "fc2_w": jax.random.normal(ks[6], (10, 50), jnp.float32) * s,
        "fc2_b": jax.random.normal(ks[7], (10,), jnp.float32) * s,
    }


# ----------------------------------------------------------------------------
# Pure-JAX reference (correctness check)
# ----------------------------------------------------------------------------
def net_forward_ref(params, x):
    dn = ("NCHW", "OIHW", "NCHW")
    x = lax.conv_general_dilated(x, params["conv1_w"], (1, 1), "VALID",
                                 dimension_numbers=dn) + params["conv1_b"][None, :, None, None]
    x = jax.nn.relu(lax.reduce_window(x, -jnp.inf, lax.max,
                                      (1, 1, 2, 2), (1, 1, 2, 2), "VALID"))
    x = lax.conv_general_dilated(x, params["conv2_w"], (1, 1), "VALID",
                                 dimension_numbers=dn) + params["conv2_b"][None, :, None, None]
    x = jax.nn.relu(lax.reduce_window(x, -jnp.inf, lax.max,
                                      (1, 1, 2, 2), (1, 1, 2, 2), "VALID"))
    x = x.reshape(-1, 320)
    x = jax.nn.relu(x @ params["fc1_w"].T + params["fc1_b"])
    x = x @ params["fc2_w"].T + params["fc2_b"]
    return jax.nn.log_softmax(x, axis=-1)


if __name__ == "__main__":
    key = jax.random.PRNGKey(0)
    kx, kp = jax.random.split(key)
    x = jax.random.normal(kx, (2, 1, 28, 28), dtype=jnp.float32)
    params = init_params(kp)

    ref = jax.block_until_ready(net_forward_ref(params, x))

    # Structural correctness: f32 operands, tight tolerance.
    fwd_f32 = jax.jit(functools.partial(net_forward, compute_dtype=jnp.float32))
    out_f32 = jax.block_until_ready(fwd_f32(params, x))
    assert out_f32.shape == (2, 10) and out_f32.dtype == jnp.float32
    assert jnp.allclose(out_f32, ref, atol=2e-4, rtol=2e-4), \
        float(jnp.max(jnp.abs(out_f32 - ref)))

    # Perf path: bf16 operands / f32 accumulation (MXU-native on v6e/v7x).
    fwd_bf16 = jax.jit(functools.partial(net_forward, compute_dtype=jnp.bfloat16))
    out_bf16 = jax.block_until_ready(fwd_bf16(params, x))
    assert out_bf16.shape == (2, 10) and out_bf16.dtype == jnp.float32
    assert jnp.allclose(out_bf16, ref, atol=5e-2, rtol=5e-2), \
        float(jnp.max(jnp.abs(out_bf16 - ref)))

    print("KERNEL_OK")
</pallas_src>

<mosaic_0001>
module attributes {stable_mosaic.version = 11 : i64} {
  func.func @_conv_pool_kernel(%arg0: i32, %arg1: memref<10x25xf32, #tpu.memory_space<vmem>>, %arg2: memref<10x1xf32, #tpu.memory_space<vmem>>, %arg3: memref<25x384xf32, #tpu.memory_space<vmem>>, %arg4: memref<25x384xf32, #tpu.memory_space<vmem>>, %arg5: memref<25x384xf32, #tpu.memory_space<vmem>>, %arg6: memref<25x384xf32, #tpu.memory_space<vmem>>, %arg7: memref<10x384xf32, #tpu.memory_space<vmem>>) attributes {dimension_semantics = [#tpu.dimension_semantics<parallel>], iteration_bounds = array<i64: 1>, scalar_prefetch = 0 : i64, scratch_operands = 0 : i64, tpu.core_type = #tpu.core_type<tc>, window_params = [{pipeline_mode = #tpu.pipeline_mode<synchronous>, transform_indices = @transform_0, window_bounds = array<i64: 10, 25>}, {pipeline_mode = #tpu.pipeline_mode<synchronous>, transform_indices = @transform_1, window_bounds = array<i64: 10, 1>}, {transform_indices = @transform_2, window_bounds = array<i64: 25, 384>}, {transform_indices = @transform_3, window_bounds = array<i64: 25, 384>}, {transform_indices = @transform_4, window_bounds = array<i64: 25, 384>}, {transform_indices = @transform_5, window_bounds = array<i64: 25, 384>}, {transform_indices = @transform_6, window_bounds = array<i64: 10, 384>}]} {
    %c0 = arith.constant 0 : index
    %c0_0 = arith.constant 0 : index
    %0 = vector.load %arg1[%c0, %c0_0] : memref<10x25xf32, #tpu.memory_space<vmem>>, vector<10x25xf32>
    %c0_1 = arith.constant 0 : index
    %c0_2 = arith.constant 0 : index
    %1 = vector.load %arg3[%c0_1, %c0_2] : memref<25x384xf32, #tpu.memory_space<vmem>>, vector<25x384xf32>
    %cst = arith.constant dense<0.000000e+00> : vector<10x384xf32>
    %2 = tpu.matmul %0, %1, %cst {dimension_numbers = #tpu.dot_dimension_numbers<[1], [0], [0], [1], [0, 0, 1, 1], [], []>} : vector<10x25xf32>, vector<25x384xf32>, vector<10x384xf32> -> vector<10x384xf32>
    %c0_3 = arith.constant 0 : index
    %c0_4 = arith.constant 0 : index
    %3 = vector.load %arg4[%c0_3, %c0_4] : memref<25x384xf32, #tpu.memory_space<vmem>>, vector<25x384xf32>
    %cst_5 = arith.constant dense<0.000000e+00> : vector<10x384xf32>
    %4 = tpu.matmul %0, %3, %cst_5 {dimension_numbers = #tpu.dot_dimension_numbers<[1], [0], [0], [1], [0, 0, 1, 1], [], []>} : vector<10x25xf32>, vector<25x384xf32>, vector<10x384xf32> -> vector<10x384xf32>
    %5 = arith.maximumf %2, %4 : vector<10x384xf32>
    %c0_6 = arith.constant 0 : index
    %c0_7 = arith.constant 0 : index
    %6 = vector.load %arg5[%c0_6, %c0_7] : memref<25x384xf32, #tpu.memory_space<vmem>>, vector<25x384xf32>
    %cst_8 = arith.constant dense<0.000000e+00> : vector<10x384xf32>
    %7 = tpu.matmul %0, %6, %cst_8 {dimension_numbers = #tpu.dot_dimension_numbers<[1], [0], [0], [1], [0, 0, 1, 1], [], []>} : vector<10x25xf32>, vector<25x384xf32>, vector<10x384xf32> -> vector<10x384xf32>
    %8 = arith.maximumf %5, %7 : vector<10x384xf32>
    %c0_9 = arith.constant 0 : index
    %c0_10 = arith.constant 0 : index
    %9 = vector.load %arg6[%c0_9, %c0_10] : memref<25x384xf32, #tpu.memory_space<vmem>>, vector<25x384xf32>
    %cst_11 = arith.constant dense<0.000000e+00> : vector<10x384xf32>
    %10 = tpu.matmul %0, %9, %cst_11 {dimension_numbers = #tpu.dot_dimension_numbers<[1], [0], [0], [1], [0, 0, 1, 1], [], []>} : vector<10x25xf32>, vector<25x384xf32>, vector<10x384xf32> -> vector<10x384xf32>
    %11 = arith.maximumf %8, %10 : vector<10x384xf32>
    %c0_12 = arith.constant 0 : index
    %c0_13 = arith.constant 0 : index
    %12 = vector.load %arg2[%c0_12, %c0_13] : memref<10x1xf32, #tpu.memory_space<vmem>>, vector<10x1xf32>
    %13 = vector.broadcast %12 : vector<10x1xf32> to vector<10x384xf32>
    %14 = arith.addf %11, %13 : vector<10x384xf32>
    %cst_14 = arith.constant 0.000000e+00 : f32
    %15 = vector.broadcast %cst_14 : f32 to vector<10x384xf32>
    %16 = arith.maximumf %14, %15 : vector<10x384xf32>
    %c0_15 = arith.constant 0 : index
    %c0_16 = arith.constant 0 : index
    %17 = vector.load %arg7[%c0_15, %c0_16] : memref<10x384xf32, #tpu.memory_space<vmem>>, vector<10x384xf32>
    tpu.vector_store %arg7[%c0_15, %c0_16], %16 {strides = array<i32>} : memref<10x384xf32, #tpu.memory_space<vmem>>, vector<10x384xf32>,
    return
  }
  func.func @transform_0(%arg0: i32) -> (i32, i32) {
    %c0_i32 = arith.constant 0 : i32
    %c0_i32_0 = arith.constant 0 : i32
    %c0_i32_1 = arith.constant 0 : i32
    return %c0_i32, %c0_i32_0 : i32, i32
  }
  func.func @transform_1(%arg0: i32) -> (i32, i32) {
    %c0_i32 = arith.constant 0 : i32
    %c0_i32_0 = arith.constant 0 : i32
    %c0_i32_1 = arith.constant 0 : i32
    return %c0_i32, %c0_i32_0 : i32, i32
  }
  func.func @transform_2(%arg0: i32) -> (i32, i32) {
    %c0_i32 = arith.constant 0 : i32
    %c0_i32_0 = arith.constant 0 : i32
    return %c0_i32, %arg0 : i32, i32
  }
  func.func @transform_3(%arg0: i32) -> (i32, i32) {
    %c0_i32 = arith.constant 0 : i32
    %c0_i32_0 = arith.constant 0 : i32
    return %c0_i32, %arg0 : i32, i32
  }
  func.func @transform_4(%arg0: i32) -> (i32, i32) {
    %c0_i32 = arith.constant 0 : i32
    %c0_i32_0 = arith.constant 0 : i32
    return %c0_i32, %arg0 : i32, i32
  }
  func.func @transform_5(%arg0: i32) -> (i32, i32) {
    %c0_i32 = arith.constant 0 : i32
    %c0_i32_0 = arith.constant 0 : i32
    return %c0_i32, %arg0 : i32, i32
  }
  func.func @transform_6(%arg0: i32) -> (i32, i32) {
    %c0_i32 = arith.constant 0 : i32
    %c0_i32_0 = arith.constant 0 : i32
    return %c0_i32, %arg0 : i32, i32
  }
}

module attributes {stable_mosaic.version = 11 : i64} {
  func.func @_conv_pool_kernel(%arg0: i32, %arg1: memref<20x250xf32, #tpu.memory_space<vmem>>, %arg2: memref<20x1xf32, #tpu.memory_space<vmem>>, %arg3: memref<250x128xf32, #tpu.memory_space<vmem>>, %arg4: memref<250x128xf32, #tpu.memory_space<vmem>>, %arg5: memref<250x128xf32, #tpu.memory_space<vmem>>, %arg6: memref<250x128xf32, #tpu.memory_space<vmem>>, %arg7: memref<20x128xf32, #tpu.memory_space<vmem>>) attributes {dimension_semantics = [#tpu.dimension_semantics<parallel>], iteration_bounds = array<i64: 1>, scalar_prefetch = 0 : i64, scratch_operands = 0 : i64, tpu.core_type = #tpu.core_type<tc>, window_params = [{pipeline_mode = #tpu.pipeline_mode<synchronous>, transform_indices = @transform_0, window_bounds = array<i64: 20, 250>}, {pipeline_mode = #tpu.pipeline_mode<synchronous>, transform_indices = @transform_1, window_bounds = array<i64: 20, 1>}, {transform_indices = @transform_2, window_bounds = array<i64: 250, 128>}, {transform_indices = @transform_3, window_bounds = array<i64: 250, 128>}, {transform_indices = @transform_4, window_bounds = array<i64: 250, 128>}, {transform_indices = @transform_5, window_bounds = array<i64: 250, 128>}, {transform_indices = @transform_6, window_bounds = array<i64: 20, 128>}]} {
    %c0 = arith.constant 0 : index
    %c0_0 = arith.constant 0 : index
    %0 = vector.load %arg1[%c0, %c0_0] : memref<20x250xf32, #tpu.memory_space<vmem>>, vector<20x250xf32>
    %c0_1 = arith.constant 0 : index
    %c0_2 = arith.constant 0 : index
    %1 = vector.load %arg3[%c0_1, %c0_2] : memref<250x128xf32, #tpu.memory_space<vmem>>, vector<250x128xf32>
    %cst = arith.constant dense<0.000000e+00> : vector<20x128xf32>
    %2 = tpu.matmul %0, %1, %cst {dimension_numbers = #tpu.dot_dimension_numbers<[1], [0], [0], [1], [0, 0, 1, 1], [], []>} : vector<20x250xf32>, vector<250x128xf32>, vector<20x128xf32> -> vector<20x128xf32>
    %c0_3 = arith.constant 0 : index
    %c0_4 = arith.constant 0 : index
    %3 = vector.load %arg4[%c0_3, %c0_4] : memref<250x128xf32, #tpu.memory_space<vmem>>, vector<250x128xf32>
    %cst_5 = arith.constant dense<0.000000e+00> : vector<20x128xf32>
    %4 = tpu.matmul %0, %3, %cst_5 {dimension_numbers = #tpu.dot_dimension_numbers<[1], [0], [0], [1], [0, 0, 1, 1], [], []>} : vector<20x250xf32>, vector<250x128xf32>, vector<20x128xf32> -> vector<20x128xf32>
    %5 = arith.maximumf %2, %4 : vector<20x128xf32>
    %c0_6 = arith.constant 0 : index
    %c0_7 = arith.constant 0 : index
    %6 = vector.load %arg5[%c0_6, %c0_7] : memref<250x128xf32, #tpu.memory_space<vmem>>, vector<250x128xf32>
    %cst_8 = arith.constant dense<0.000000e+00> : vector<20x128xf32>
    %7 = tpu.matmul %0, %6, %cst_8 {dimension_numbers = #tpu.dot_dimension_numbers<[1], [0], [0], [1], [0, 0, 1, 1], [], []>} : vector<20x250xf32>, vector<250x128xf32>, vector<20x128xf32> -> vector<20x128xf32>
    %8 = arith.maximumf %5, %7 : vector<20x128xf32>
    %c0_9 = arith.constant 0 : index
    %c0_10 = arith.constant 0 : index
    %9 = vector.load %arg6[%c0_9, %c0_10] : memref<250x128xf32, #tpu.memory_space<vmem>>, vector<250x128xf32>
    %cst_11 = arith.constant dense<0.000000e+00> : vector<20x128xf32>
    %10 = tpu.matmul %0, %9, %cst_11 {dimension_numbers = #tpu.dot_dimension_numbers<[1], [0], [0], [1], [0, 0, 1, 1], [], []>} : vector<20x250xf32>, vector<250x128xf32>, vector<20x128xf32> -> vector<20x128xf32>
    %11 = arith.maximumf %8, %10 : vector<20x128xf32>
    %c0_12 = arith.constant 0 : index
    %c0_13 = arith.constant 0 : index
    %12 = vector.load %arg2[%c0_12, %c0_13] : memref<20x1xf32, #tpu.memory_space<vmem>>, vector<20x1xf32>
    %13 = vector.broadcast %12 : vector<20x1xf32> to vector<20x128xf32>
    %14 = arith.addf %11, %13 : vector<20x128xf32>
    %cst_14 = arith.constant 0.000000e+00 : f32
    %15 = vector.broadcast %cst_14 : f32 to vector<20x128xf32>
    %16 = arith.maximumf %14, %15 : vector<20x128xf32>
    %c0_15 = arith.constant 0 : index
    %c0_16 = arith.constant 0 : index
    %17 = vector.load %arg7[%c0_15, %c0_16] : memref<20x128xf32, #tpu.memory_space<vmem>>, vector<20x128xf32>
    tpu.vector_store %arg7[%c0_15, %c0_16], %16 {strides = array<i32>} : memref<20x128xf32, #tpu.memory_space<vmem>>, vector<20x128xf32>,
    return
  }
  func.func @transform_0(%arg0: i32) -> (i32, i32) {
    %c0_i32 = arith.constant 0 : i32
    %c0_i32_0 = arith.constant 0 : i32
    %c0_i32_1 = arith.constant 0 : i32
    return %c0_i32, %c0_i32_0 : i32, i32
  }
  func.func @transform_1(%arg0: i32) -> (i32, i32) {
    %c0_i32 = arith.constant 0 : i32
    %c0_i32_0 = arith.constant 0 : i32
    %c0_i32_1 = arith.constant 0 : i32
    return %c0_i32, %c0_i32_0 : i32, i32
  }
  func.func @transform_2(%arg0: i32) -> (i32, i32) {
    %c0_i32 = arith.constant 0 : i32
    %c0_i32_0 = arith.constant 0 : i32
    return %c0_i32, %arg0 : i32, i32
  }
  func.func @transform_3(%arg0: i32) -> (i32, i32) {
    %c0_i32 = arith.constant 0 : i32
    %c0_i32_0 = arith.constant 0 : i32
    return %c0_i32, %arg0 : i32, i32
  }
  func.func @transform_4(%arg0: i32) -> (i32, i32) {
    %c0_i32 = arith.constant 0 : i32
    %c0_i32_0 = arith.constant 0 : i32
    return %c0_i32, %arg0 : i32, i32
  }
  func.func @transform_5(%arg0: i32) -> (i32, i32) {
    %c0_i32 = arith.constant 0 : i32
    %c0_i32_0 = arith.constant 0 : i32
    return %c0_i32, %arg0 : i32, i32
  }
  func.func @transform_6(%arg0: i32) -> (i32, i32) {
    %c0_i32 = arith.constant 0 : i32
    %c0_i32_0 = arith.constant 0 : i32
    return %c0_i32, %arg0 : i32, i32
  }
}

module attributes {stable_mosaic.version = 11 : i64} {
  func.func @_fc_head_kernel(%arg0: i32, %arg1: memref<8x320xf32, #tpu.memory_space<vmem>>, %arg2: memref<320x50xf32, #tpu.memory_space<vmem>>, %arg3: memref<1x50xf32, #tpu.memory_space<vmem>>, %arg4: memref<50x10xf32, #tpu.memory_space<vmem>>, %arg5: memref<1x10xf32, #tpu.memory_space<vmem>>, %arg6: memref<8x10xf32, #tpu.memory_space<vmem>>) attributes {dimension_semantics = [#tpu.dimension_semantics<parallel>], iteration_bounds = array<i64: 1>, scalar_prefetch = 0 : i64, scratch_operands = 0 : i64, tpu.core_type = #tpu.core_type<tc>, window_params = [{transform_indices = @transform_0, window_bounds = array<i64: 8, 320>}, {pipeline_mode = #tpu.pipeline_mode<synchronous>, transform_indices = @transform_1, window_bounds = array<i64: 320, 50>}, {pipeline_mode = #tpu.pipeline_mode<synchronous>, transform_indices = @transform_2, window_bounds = array<i64: 1, 50>}, {pipeline_mode = #tpu.pipeline_mode<synchronous>, transform_indices = @transform_3, window_bounds = array<i64: 50, 10>}, {pipeline_mode = #tpu.pipeline_mode<synchronous>, transform_indices = @transform_4, window_bounds = array<i64: 1, 10>}, {transform_indices = @transform_5, window_bounds = array<i64: 8, 10>}]} {
    %c0 = arith.constant 0 : index
    %c0_0 = arith.constant 0 : index
    %0 = vector.load %arg1[%c0, %c0_0] : memref<8x320xf32, #tpu.memory_space<vmem>>, vector<8x320xf32>
    %c0_1 = arith.constant 0 : index
    %c0_2 = arith.constant 0 : index
    %1 = vector.load %arg2[%c0_1, %c0_2] : memref<320x50xf32, #tpu.memory_space<vmem>>, vector<320x50xf32>
    %cst = arith.constant dense<0.000000e+00> : vector<8x50xf32>
    %2 = tpu.matmul %0, %1, %cst {dimension_numbers = #tpu.dot_dimension_numbers<[1], [0], [0], [1], [0, 0, 1, 1], [], []>} : vector<8x320xf32>, vector<320x50xf32>, vector<8x50xf32> -> vector<8x50xf32>
    %c0_3 = arith.constant 0 : index
    %c0_4 = arith.constant 0 : index
    %3 = vector.load %arg3[%c0_3, %c0_4] : memref<1x50xf32, #tpu.memory_space<vmem>>, vector<1x50xf32>
    %4 = vector.broadcast %3 : vector<1x50xf32> to vector<8x50xf32>
    %5 = arith.addf %2, %4 : vector<8x50xf32>
    %cst_5 = arith.constant 0.000000e+00 : f32
    %6 = vector.broadcast %cst_5 : f32 to vector<8x50xf32>
    %7 = arith.maximumf %5, %6 : vector<8x50xf32>
    %c0_6 = arith.constant 0 : index
    %c0_7 = arith.constant 0 : index
    %8 = vector.load %arg4[%c0_6, %c0_7] : memref<50x10xf32, #tpu.memory_space<vmem>>, vector<50x10xf32>
    %cst_8 = arith.constant dense<0.000000e+00> : vector<8x10xf32>
    %9 = tpu.matmul %7, %8, %cst_8 {dimension_numbers = #tpu.dot_dimension_numbers<[1], [0], [0], [1], [0, 0, 1, 1], [], []>} : vector<8x50xf32>, vector<50x10xf32>, vector<8x10xf32> -> vector<8x10xf32>
    %c0_9 = arith.constant 0 : index
    %c0_10 = arith.constant 0 : index
    %10 = vector.load %arg5[%c0_9, %c0_10] : memref<1x10xf32, #tpu.memory_space<vmem>>, vector<1x10xf32>
    %11 = vector.broadcast %10 : vector<1x10xf32> to vector<8x10xf32>
    %12 = arith.addf %9, %11 : vector<8x10xf32>
    %cst_11 = arith.constant dense<0xFF800000> : vector<8xf32>
    %13 = vector.multi_reduction <maximumf>, %12, %cst_11 [1] : vector<8x10xf32> to vector<8xf32>
    %14 = vector.shape_cast %13 : vector<8xf32> to vector<8x1xf32>
    %15 = vector.broadcast %14 : vector<8x1xf32> to vector<8x10xf32>
    %16 = arith.subf %12, %15 : vector<8x10xf32>
    %17 = math.exp %16 : vector<8x10xf32>
    %cst_12 = arith.constant dense<0.000000e+00> : vector<8xf32>
    %18 = vector.multi_reduction <add>, %17, %cst_12 [1] : vector<8x10xf32> to vector<8xf32>
    %19 = vector.shape_cast %18 : vector<8xf32> to vector<8x1xf32>
    %20 = math.log %19 : vector<8x1xf32>
    %21 = vector.broadcast %20 : vector<8x1xf32> to vector<8x10xf32>
    %22 = arith.subf %16, %21 : vector<8x10xf32>
    %c0_13 = arith.constant 0 : index
    %c0_14 = arith.constant 0 : index
    %23 = vector.load %arg6[%c0_13, %c0_14] : memref<8x10xf32, #tpu.memory_space<vmem>>, vector<8x10xf32>
    tpu.vector_store %arg6[%c0_13, %c0_14], %22 {strides = array<i32>} : memref<8x10xf32, #tpu.memory_space<vmem>>, vector<8x10xf32>,
    return
  }
  func.func @transform_0(%arg0: i32) -> (i32, i32) {
    %c0_i32 = arith.constant 0 : i32
    %c0_i32_0 = arith.constant 0 : i32
    return %arg0, %c0_i32 : i32, i32
  }
  func.func @transform_1(%arg0: i32) -> (i32, i32) {
    %c0_i32 = arith.constant 0 : i32
    %c0_i32_0 = arith.constant 0 : i32
    %c0_i32_1 = arith.constant 0 : i32
    return %c0_i32, %c0_i32_0 : i32, i32
  }
  func.func @transform_2(%arg0: i32) -> (i32, i32) {
    %c0_i32 = arith.constant 0 : i32
    %c0_i32_0 = arith.constant 0 : i32
    %c0_i32_1 = arith.constant 0 : i32
    return %c0_i32, %c0_i32_0 : i32, i32
  }
  func.func @transform_3(%arg0: i32) -> (i32, i32) {
    %c0_i32 = arith.constant 0 : i32
    %c0_i32_0 = arith.constant 0 : i32
    %c0_i32_1 = arith.constant 0 : i32
    return %c0_i32, %c0_i32_0 : i32, i32
  }
  func.func @transform_4(%arg0: i32) -> (i32, i32) {
    %c0_i32 = arith.constant 0 : i32
    %c0_i32_0 = arith.constant 0 : i32
    %c0_i32_1 = arith.constant 0 : i32
    return %c0_i32, %c0_i32_0 : i32, i32
  }
  func.func @transform_5(%arg0: i32) -> (i32, i32) {
    %c0_i32 = arith.constant 0 : i32
    %c0_i32_0 = arith.constant 0 : i32
    return %arg0, %c0_i32 : i32, i32
  }
}

</mosaic_0001>

<bundles_post_ra>
// kernel: net_forward.3
= control target key start
LH: loop header
LB: loop body
LE: loop exit
PB: predicated region body
PF: predicated region fallthrough
CT: control target
= control target key end

     0   :  { %vm44_vm0 = vcmask 1040384   ;;  %v957_v3 = vmov 0.0   ;;  %v958_v8 = vmov 0   ;;  %vm959_vm1 = vmmov 1   ;;  %s1250_s2 = inlined_call_operand.vmem [shape: f32[25,384], index: 2, kind: input, shape index: {}]   ;;  %s1251_s0 = inlined_call_operand.vmem [shape: f32[10,25], index: 0, kind: input, shape index: {}]   ;;  %s1252_s3 = inlined_call_operand.vmem [shape: f32[25,384], index: 3, kind: input, shape index: {}]   ;;  %s1253_s4 = inlined_call_operand.vmem [shape: f32[25,384], index: 4, kind: input, shape index: {}]   ;;  %s1254_s1 = inlined_call_operand.vmem [shape: f32[10,1], index: 1, kind: input, shape index: {}]   ;;  %s1255_s5 = inlined_call_operand.vmem [shape: f32[25,384], index: 5, kind: input, shape index: {}]   ;;  %s1256_s6 = inlined_call_operand.vmem [shape: f32[10,384], index: 6, kind: output, shape index: {}]  }
   0x1   :  { %v26_v0 = vld [vmem:[%s1250_s2 + $0x8] sm:$0xff]  ;;  %v29_v1 = vld [vmem:[%s1250_s2 + $0x20] sm:$0xff]  ;;  %v27_v2 = vld [vmem:[%s1250_s2 + $0x10] sm:$0xff]  ;;  %118 = vmatprep.mubr.f32.mxu0 %v957_v3  ;;  %956 = vset.pattern.permute.xlu0 %v958_v8  ;;  %vm37_vm3 = vcmask 203776  }
   0x2   :  { %v873_v4 = vpack.c.bf16 %v29_v1, %v26_v0  ;;  %v30_v5 = vld [vmem:[%s1250_s2 + $0x28] sm:$0xff]  ;;  %v25_v6 = vld [vmem:[%s1250_s2] sm:$0xff]  ;;  %v28_v7 = vld [vmem:[%s1250_s2 + $0x18] sm:$0xff] }
   0x3   :  { %v883_v9 = vpack.c.bf16 %v30_v5, %v27_v2  ;;  %v875_v10 = vpack.c.bf16 %v28_v7, %v25_v6  ;;  %v32_v11 = vld [vmem:[%s1250_s2 + $0x38] sm:$0xff]  ;;  %v35_v12 = vld [vmem:[%s1250_s2 + $0x50] sm:$0x1]  ;;  %vm1021_vm2 = vmpackc.low %vm44_vm0, %vm959_vm1 }
   0x4   :  { %874 = vmatprep.subr.bf16.mxu0 %v873_v4  ;;  %v877_v14 = vpack.c.bf16 %v35_v12, %v32_v11  ;;  %v33_v15 = vld [vmem:[%s1250_s2 + $0x40] sm:$0xff]  ;;  %v36_v16 = vld [vmem:[%s1250_s2 + $0x58] sm:$0x1]  ;;  %v31_v17 = vld [vmem:[%s1250_s2 + $0x30] sm:$0xff] }
   0x5   :  { %884 = vmatprep.subr.bf16.mxu1 %v883_v9  ;;  %876 = vmatpush1.bf16.msra.mxu0 %v875_v10  ;;  %v887_v18 = vpack.c.bf16 %v36_v16, %v33_v15  ;;  %v34_v19 = vld [vmem:[%s1250_s2 + $0x48] sm:$0x1]  ;;  %v1040_v20 = vld [vmem:[%s1251_s0] sm:$0xff]  ;;  %v208_v24 = vld [vmem:[%s1252_s3 + $0x10] sm:$0xff] }
   0x6   :  { %v207_v21 = vld [vmem:[%s1252_s3 + $0x8] sm:$0xff]  ;;  %886 = vmatpush3.bf16.msra.mxu1 %v883_v9  ;;  %879 = vmatprep.subr.msk.bf16.mxu0 %vm1021_vm2, %v877_v14  ;;  %v880_v22 = vpack.c.bf16 %v34_v19, %v31_v17  ;;  %v210_v23 = vld [vmem:[%s1252_s3 + $0x20] sm:$0xff]  ;;  %v209_v29 = vld [vmem:[%s1252_s3 + $0x18] sm:$0xff] }
   0x7   :  { %v211_v25 = vld [vmem:[%s1252_s3 + $0x28] sm:$0xff]  ;;  %889 = vmatprep.subr.msk.bf16.mxu1 %vm1021_vm2, %v887_v18  ;;  %837 = vmatprep.mubr.msk.f32.mxu1 %vm37_vm3, %v1040_v20  ;;  %v893_v26 = vpack.c.bf16 %v210_v23, %v207_v21  ;;  %v206_v28 = vld [vmem:[%s1252_s3] sm:$0xff]  ;;  %v213_v30 = vld [vmem:[%s1252_s3 + $0x38] sm:$0xff] }
   0x8   :  { %v903_v27 = vpack.c.bf16 %v211_v25, %v208_v24  ;;  %v216_v31 = vld [vmem:[%s1252_s3 + $0x50] sm:$0x1]  ;;  %v214_v32 = vld [vmem:[%s1252_s3 + $0x40] sm:$0xff]  ;;  %v895_v33 = vpack.c.bf16 %v209_v29, %v206_v28  ;;  %v217_v34 = vld [vmem:[%s1252_s3 + $0x58] sm:$0x1] }
   0x9   :  { %882 = vmatpush1.bf16.msk.msra.mxu0 %vm1021_vm2, %v880_v22  ;;  %v1085_v35 = vld [vmem:[%s1251_s0 + $0x8] sm:$0x3]  ;;  %v212_v36 = vld [vmem:[%s1252_s3 + $0x30] sm:$0xff]  ;;  %v897_v38 = vpack.c.bf16 %v216_v31, %v213_v30  ;;  %v907_v39 = vpack.c.bf16 %v217_v34, %v214_v32  ;;  %v389_v41 = vld [vmem:[%s1253_s4 + $0x20] sm:$0xff] }
   0xa   :  { %892 = vmatpush3.bf16.msk.msra.mxu1 %vm1021_vm2, %v887_v18  ;;  %894 = vmatprep.subr.bf16.mxu0 %v893_v26  ;;  %v215_v37 = vld [vmem:[%s1252_s3 + $0x48] sm:$0x1]  ;;  %v387_v42 = vld [vmem:[%s1253_s4 + $0x10] sm:$0xff]  ;;  %v385_v46 = vld [vmem:[%s1253_s4] sm:$0xff] }
   0xb   :  { %904 = vmatprep.subr.bf16.mxu1 %v903_v27  ;;  %v386_v40 = vld [vmem:[%s1253_s4 + $0x8] sm:$0xff]  ;;  %v900_v44 = vpack.c.bf16 %v215_v37, %v212_v36  ;;  %v388_v47 = vld [vmem:[%s1253_s4 + $0x18] sm:$0xff]  ;;  %v395_v50 = vld [vmem:[%s1253_s4 + $0x50] sm:$0x1] }
   0xc   :  { %779 = vmatmul.mubr.msk.f32.vlgmr.msra.gmra.mrb[0].mxu0 %vm37_vm3, %v1040_v20  ;;  %v390_v43 = vld [vmem:[%s1253_s4 + $0x28] sm:$0xff]  ;;  %v913_v45 = vpack.c.bf16 %v389_v41, %v386_v40  ;;  %v392_v49 = vld [vmem:[%s1253_s4 + $0x38] sm:$0xff]  ;;  %v393_v51 = vld [vmem:[%s1253_s4 + $0x40] sm:$0xff]  ;;  %v915_v53 = vpack.c.bf16 %v388_v47, %v385_v46 }
   0xd   :  { %838 = vmatmul.mubr.msk.f32.vlgmr.msra.gmra.mrb[0].mxu1 %vm37_vm3, %v1085_v35  ;;  %896 = vmatpush1.bf16.msra.mxu0 %v895_v33  ;;  %v923_v48 = vpack.c.bf16 %v390_v43, %v387_v42  ;;  %v396_v52 = vld [vmem:[%s1253_s4 + $0x58] sm:$0x1]  ;;  %v391_v54 = vld [vmem:[%s1253_s4 + $0x30] sm:$0xff]  ;;  %v394_v55 = vld [vmem:[%s1253_s4 + $0x48] sm:$0x1]  ;;  %v917_v57 = vpack.c.bf16 %v395_v50, %v392_v49 }
   0xe   :  { %906 = vmatpush3.bf16.msra.mxu1 %v903_v27  ;;  %124 = vmatprep.mubr.f32.mxu0 %v957_v3  ;;  %v743_v56 = vld [vmem:[%s1254_s1] sm:$0xff]  ;;  %v927_v58 = vpack.c.bf16 %v396_v52, %v393_v51  ;;  %v565_v59 = vld [vmem:[%s1255_s5 + $0x8] sm:$0xff]  ;;  %v566_v61 = vld [vmem:[%s1255_s5 + $0x10] sm:$0xff]  ;;  %v920_v63 = vpack.c.bf16 %v394_v55, %v391_v54 }
   0xf   :  { %899 = vmatprep.subr.msk.bf16.mxu0 %vm1021_vm2, %v897_v38  ;;  %909 = vmatprep.subr.msk.bf16.mxu1 %vm1021_vm2, %v907_v39  ;;  %v568_v60 = vld [vmem:[%s1255_s5 + $0x20] sm:$0xff]  ;;  %v569_v62 = vld [vmem:[%s1255_s5 + $0x28] sm:$0xff]  ;;  %v567_v2 = vld [vmem:[%s1255_s5 + $0x18] sm:$0xff] }
  0x10   :  { %780 = vmatmul.mubr.msk.f32.gmra.mrb[2].mxu0 %vm37_vm3, %v1085_v35  ;;  %848 = vmatprep.mubr.msk.f32.mxu1 %vm37_vm3, %v1040_v20  ;;  %v933_v0 = vpack.c.bf16 %v568_v60, %v565_v59  ;;  %v564_v1 = vld [vmem:[%s1255_s5] sm:$0xff]  ;;  %v943_v4 = vpack.c.bf16 %v569_v62, %v566_v61  ;;  %v571_v5 = vld [vmem:[%s1255_s5 + $0x38] sm:$0xff]  ;;  %v574_v6 = vld [vmem:[%s1255_s5 + $0x50] sm:$0x1] }
  0x11   :  { %902 = vmatpush1.bf16.msk.msra.mxu0 %vm1021_vm2, %v900_v44  ;;  %291 = vmatprep.mubr.f32.mxu0 %v957_v3  ;;  %v572_v7 = vld [vmem:[%s1255_s5 + $0x40] sm:$0xff]  ;;  %v575_v8 = vld [vmem:[%s1255_s5 + $0x58] sm:$0x1]  ;;  %v744_v9 = vld [vmem:[%s1254_s1 + $0x8] sm:$0x3]  ;;  %v935_v10 = vpack.c.bf16 %v567_v2, %v564_v1  ;;  %v937_v14 = vpack.c.bf16 %v574_v6, %v571_v5 }
  0x12   :  { %912 = vmatpush3.bf16.msk.msra.mxu1 %vm1021_vm2, %v907_v39  ;;  %914 = vmatprep.subr.bf16.mxu0 %v913_v45  ;;  %v570_v11 = vld [vmem:[%s1255_s5 + $0x30] sm:$0xff]  ;;  %v573_v12 = vld [vmem:[%s1255_s5 + $0x48] sm:$0x1]  ;;  %v947_v15 = vpack.c.bf16 %v575_v8, %v572_v7 }
  0x13   :  { %924 = vmatprep.subr.bf16.mxu1 %v923_v48  ;;  %747 = vperm.xlu0 %956, %v743_v56   ;;  %v940_v16 = vpack.c.bf16 %v573_v12, %v570_v11 }
  0x14   :  { %786 = vmatmul.mubr.msk.f32.vlgmr.msra.gmra.mrb[4].mxu0 %vm37_vm3, %v1040_v20 }
  0x15   :  { %849 = vmatmul.mubr.msk.f32.vlgmr.msra.gmra.mrb[2].mxu1 %vm37_vm3, %v1085_v35  ;;  %916 = vmatpush1.bf16.msra.mxu0 %v915_v53 }
  0x16   :  { %926 = vmatpush3.bf16.msra.mxu1 %v923_v48  ;;  %297 = vmatprep.mubr.f32.mxu0 %v957_v3 }
  0x17   :  { %919 = vmatprep.subr.msk.bf16.mxu0 %vm1021_vm2, %v917_v57  ;;  %929 = vmatprep.subr.msk.bf16.mxu1 %vm1021_vm2, %v927_v58 }
  0x18   :  { %787 = vmatmul.mubr.msk.f32.gmra.mrb[6].mxu0 %vm37_vm3, %v1085_v35  ;;  %859 = vmatprep.mubr.msk.f32.mxu1 %vm37_vm3, %v1040_v20 }
  0x19   :  { %922 = vmatpush1.bf16.msk.msra.mxu0 %vm1021_vm2, %v920_v63  ;;  %470 = vmatprep.mubr.f32.mxu0 %v957_v3 }
  0x1a   :  { %932 = vmatpush3.bf16.msk.msra.mxu1 %vm1021_vm2, %v927_v58  ;;  %934 = vmatprep.subr.bf16.mxu0 %v933_v0 }
  0x1b   :  { %944 = vmatprep.subr.bf16.mxu1 %v943_v4  ;;  %752 = vperm.xlu0 %956, %v744_v9  }
  0x1c   :  { %793 = vmatmul.mubr.msk.f32.vlgmr.msra.gmra.mrb[8].mxu0 %vm37_vm3, %v1040_v20 }
  0x1d   :  { %860 = vmatmul.mubr.msk.f32.vlgmr.msra.gmra.mrb[4].mxu1 %vm37_vm3, %v1085_v35  ;;  %936 = vmatpush1.bf16.msra.mxu0 %v935_v10 }
  0x1e   :  { %946 = vmatpush3.bf16.msra.mxu1 %v943_v4  ;;  %476 = vmatprep.mubr.f32.mxu0 %v957_v3 }
  0x1f   :  { %939 = vmatprep.subr.msk.bf16.mxu0 %vm1021_vm2, %v937_v14  ;;  %949 = vmatprep.subr.msk.bf16.mxu1 %vm1021_vm2, %v947_v15 }
  0x20   :  { %794 = vmatmul.mubr.msk.f32.gmra.mrb[10].mxu0 %vm37_vm3, %v1085_v35  ;;  %870 = vmatprep.mubr.msk.f32.mxu1 %vm37_vm3, %v1040_v20 }
  0x21   :  { %942 = vmatpush1.bf16.msk.msra.mxu0 %vm1021_vm2, %v940_v16  ;;  %649 = vmatprep.mubr.f32.mxu0 %v957_v3 }
  0x22   :  { %952 = vmatpush3.bf16.msk.msra.mxu1 %vm1021_vm2, %v947_v15 }
  0x24   :  { %800 = vmatmul.mubr.msk.f32.vlgmr.msra.gmra.mrb[12].mxu0 %vm37_vm3, %v1040_v20 }
  0x25   :  { %871 = vmatmul.mubr.msk.f32.vlgmr.msra.gmra.mrb[6].mxu1 %vm37_vm3, %v1085_v35  ;;  %655 = vmatprep.mubr.f32.mxu0 %v957_v3 }
  0x28   :  { %801 = vmatmul.mubr.msk.f32.gmra.mrb[14].mxu0 %vm37_vm3, %v1085_v35 }
  0x92   :  { %v748_v40 = vpop.permute.xlu0 %747 }
  0x9a   :  { %v753_v47 = vpop.permute.xlu0 %752 }
  0xdf   :  { %v120_v17 = vpop.f32.mrb[0].mxu0 }
  0xe0   :  { %v122_v18 = vpop.f32.mrb[1].mxu0  ;;  %v839_v19 = vpop.f32.mrb[0].mxu1 }
  0xe1   :  { %v197_v21 = vpop.f32.mrb[1].mxu1 }
  0xe3   :  { %v126_v22 = vpop.f32.mrb[2].mxu0 }
  0xe4   :  { %v128_v23 = vpop.f32.mrb[3].mxu0 }
  0xe7   :  { %v293_v24 = vpop.f32.mrb[4].mxu0 }
  0xe8   :  { %v379_v13 = vmax.f32 %v120_v17, %v293_v24  ;;  %v850_v25 = vpop.f32.mrb[2].mxu1  ;;  %v295_v26 = vpop.f32.mrb[5].mxu0 }
  0xe9   :  { %v384_v27 = vmax.f32 %v839_v19, %v850_v25  ;;  %v380_v20 = vmax.f32 %v122_v18, %v295_v26  ;;  %v370_v28 = vpop.f32.mrb[3].mxu1 }
  0xea   :  { %v381_v29 = vmax.f32 %v197_v21, %v370_v28 }
  0xeb   :  { %v299_v30 = vpop.f32.mrb[6].mxu0 }
  0xec   :  { %v382_v31 = vmax.f32 %v126_v22, %v299_v30  ;;  %v301_v3 = vpop.f32.mrb[7].mxu0 }
  0xed   :  { %v383_v32 = vmax.f32 %v128_v23, %v301_v3 }
  0xef   :  { %v472_v33 = vpop.f32.mrb[8].mxu0 }
  0xf0   :  { %v558_v34 = vmax.f32 %v379_v13, %v472_v33  ;;  %v861_v35 = vpop.f32.mrb[4].mxu1  ;;  %v474_v36 = vpop.f32.mrb[9].mxu0 }
  0xf1   :  { %v563_v37 = vmax.f32 %v384_v27, %v861_v35  ;;  %v559_v38 = vmax.f32 %v380_v20, %v474_v36  ;;  %v549_v39 = vpop.f32.mrb[5].mxu1 }
  0xf2   :  { %v560_v41 = vmax.f32 %v381_v29, %v549_v39 }
  0xf3   :  { %v478_v42 = vpop.f32.mrb[10].mxu0 }
  0xf4   :  { %v561_v43 = vmax.f32 %v382_v31, %v478_v42  ;;  %v480_v44 = vpop.f32.mrb[11].mxu0 }
  0xf5   :  { %v562_v45 = vmax.f32 %v383_v32, %v480_v44 }
  0xf7   :  { %v651_v46 = vpop.f32.mrb[12].mxu0 }
  0xf8   :  { %v737_v48 = vmax.f32 %v558_v34, %v651_v46  ;;  %v872_v49 = vpop.f32.mrb[6].mxu1  ;;  %v653_v50 = vpop.f32.mrb[13].mxu0 }
  0xf9   :  { %v742_v51 = vmax.f32 %v563_v37, %v872_v49  ;;  %v738_v52 = vmax.f32 %v559_v38, %v653_v50  ;;  %v728_v53 = vpop.f32.mrb[7].mxu1 }
  0xfa   :  { %v755_v54 = vadd.f32 %v748_v40, %v737_v48  ;;  %v739_v55 = vmax.f32 %v560_v41, %v728_v53 }
  0xfb   :  { %v756_v56 = vadd.f32 %v748_v40, %v738_v52  ;;  %v760_v57 = vadd.f32 %v753_v47, %v742_v51  ;;  %v657_v58 = vpop.f32.mrb[14].mxu0 }
  0xfc   :  { %v761_v59 = vmax.f32 %v755_v54, 0.0  ;;  %v757_v60 = vadd.f32 %v748_v40, %v739_v55  ;;  %v740_v61 = vmax.f32 %v561_v43, %v657_v58  ;;  %v659_v62 = vpop.f32.mrb[15].mxu0 }
  0xfd   :  { %v762_v63 = vmax.f32 %v756_v56, 0.0  ;;  %v766_v0 = vmax.f32 %v760_v57, 0.0  ;;  %v741_v1 = vmax.f32 %v562_v45, %v659_v62 }
  0xfe   :  { %767 = vst [vmem:[%s1256_s6] sm:$0xff] %v761_v59  ;;  %v763_v2 = vmax.f32 %v757_v60, 0.0  ;;  %v758_v4 = vadd.f32 %v753_v47, %v740_v61 }
  0xff   :  { %768 = vst [vmem:[%s1256_s6 + $0x8] sm:$0xff] %v762_v63  ;;  %772 = vst [vmem:[%s1256_s6 + $0x28] sm:$0x3] %v766_v0  ;;  %v759_v5 = vadd.f32 %v753_v47, %v741_v1 }
 0x100   :  { %769 = vst [vmem:[%s1256_s6 + $0x10] sm:$0xff] %v763_v2  ;;  %v764_v6 = vmax.f32 %v758_v4, 0.0 }
 0x101   :  { %v765_v7 = vmax.f32 %v759_v5, 0.0 }
 0x102   :  { %770 = vst [vmem:[%s1256_s6 + $0x18] sm:$0x3] %v764_v6 }
 0x103   :  { %771 = vst [vmem:[%s1256_s6 + $0x20] sm:$0x3] %v765_v7 }

// kernel: net_forward.4
= control target key start
LH: loop header
LB: loop body
LE: loop exit
PB: predicated region body
PF: predicated region fallthrough
CT: control target
= control target key end

     0   :  { %v856_v3 = vmov 0   ;;  %vm61_vm0 = vcmask 998400   ;;  %vm71_vm1 = vcmask 1041408   ;;  %vm857_vm2 = vmmov 1   ;;  %s1374_s2 = inlined_call_operand.vmem [shape: f32[250,128], index: 2, kind: input, shape index: {}]   ;;  %s1375_s3 = inlined_call_operand.vmem [shape: f32[250,128], index: 3, kind: input, shape index: {}]   ;;  %s1376_s0 = inlined_call_operand.vmem [shape: f32[20,250], index: 0, kind: input, shape index: {}]   ;;  %s1377_s4 = inlined_call_operand.vmem [shape: f32[250,128], index: 4, kind: input, shape index: {}]   ;;  %s1378_s5 = inlined_call_operand.vmem [shape: f32[250,128], index: 5, kind: input, shape index: {}]   ;;  %s1379_s1 = inlined_call_operand.vmem [shape: f32[20,1], index: 1, kind: input, shape index: {}]   ;;  %s1380_s6 = inlined_call_operand.vmem [shape: f32[20,128], index: 6, kind: output, shape index: {}]  }
   0x1   :  { %v45_v0 = vld [vmem:[%s1374_s2 + $0x80] sm:$0xff]  ;;  %v46_v1 = vld [vmem:[%s1374_s2 + $0x88] sm:$0xff]  ;;  %854 = vset.pattern.permute.xlu0 %v856_v3  ;;  %855 = vset.pattern.permute.xlu1 %v856_v3  ;;  %v47_v12 = vld [vmem:[%s1374_s2 + $0x90] sm:$0xff] }
   0x2   :  { %v171_v2 = vld [vmem:[%s1375_s3 + $0x80] sm:$0xff]  ;;  %v720_v4 = vpack.c.bf16 %v46_v1, %v45_v0  ;;  %v172_v5 = vld [vmem:[%s1375_s3 + $0x88] sm:$0xff]  ;;  %v48_v14 = vld [vmem:[%s1374_s2 + $0x98] sm:$0xff] }
   0x3   :  { %v29_v6 = vld [vmem:[%s1374_s2] sm:$0xff]  ;;  %v30_v7 = vld [vmem:[%s1374_s2 + $0x8] sm:$0xff]  ;;  %v753_v8 = vpack.c.bf16 %v172_v5, %v171_v2  ;;  %v173_v15 = vld [vmem:[%s1375_s3 + $0x90] sm:$0xff]  ;;  %v724_v17 = vpack.c.bf16 %v48_v14, %v47_v12 }
   0x4   :  { %v722_v9 = vpack.c.bf16 %v30_v7, %v29_v6  ;;  %v155_v10 = vld [vmem:[%s1375_s3] sm:$0xff]  ;;  %v156_v11 = vld [vmem:[%s1375_s3 + $0x8] sm:$0xff]  ;;  %721 = vmatprep.subr.bf16.mxu0 %v720_v4  ;;  %v174_v16 = vld [vmem:[%s1375_s3 + $0x98] sm:$0xff] }
   0x5   :  { %v755_v13 = vpack.c.bf16 %v156_v11, %v155_v10  ;;  %754 = vmatprep.subr.bf16.mxu1 %v753_v8  ;;  %v757_v18 = vpack.c.bf16 %v174_v16, %v173_v15  ;;  %v31_v19 = vld [vmem:[%s1374_s2 + $0x10] sm:$0xff]  ;;  %v32_v20 = vld [vmem:[%s1374_s2 + $0x18] sm:$0xff]  ;;  %v49_v24 = vld [vmem:[%s1374_s2 + $0xa0] sm:$0xff] }
   0x6   :  { %723 = vmatpush3.bf16.msra.mxu0 %v722_v9  ;;  %v157_v21 = vld [vmem:[%s1375_s3 + $0x10] sm:$0xff]  ;;  %v726_v22 = vpack.c.bf16 %v32_v20, %v31_v19  ;;  %v158_v23 = vld [vmem:[%s1375_s3 + $0x18] sm:$0xff]  ;;  %v50_v25 = vld [vmem:[%s1374_s2 + $0xa8] sm:$0xff] }
   0x7   :  { %756 = vmatpush3.bf16.msra.mxu1 %v755_v13  ;;  %725 = vmatprep.subr.bf16.mxu0 %v724_v17  ;;  %v759_v26 = vpack.c.bf16 %v158_v23, %v157_v21  ;;  %v728_v27 = vpack.c.bf16 %v50_v25, %v49_v24  ;;  %v175_v28 = vld [vmem:[%s1375_s3 + $0xa0] sm:$0xff]  ;;  %v176_v29 = vld [vmem:[%s1375_s3 + $0xa8] sm:$0xff]  ;;  %v51_v36 = vld [vmem:[%s1374_s2 + $0xb0] sm:$0xff] }
   0x8   :  { %758 = vmatprep.subr.bf16.mxu1 %v757_v18  ;;  %v33_v30 = vld [vmem:[%s1374_s2 + $0x20] sm:$0xff]  ;;  %v761_v31 = vpack.c.bf16 %v176_v29, %v175_v28  ;;  %v34_v32 = vld [vmem:[%s1374_s2 + $0x28] sm:$0xff]  ;;  %v52_v37 = vld [vmem:[%s1374_s2 + $0xb8] sm:$0xff] }
   0x9   :  { %v159_v33 = vld [vmem:[%s1375_s3 + $0x20] sm:$0xff]  ;;  %v160_v34 = vld [vmem:[%s1375_s3 + $0x28] sm:$0xff]  ;;  %v730_v35 = vpack.c.bf16 %v34_v32, %v33_v30  ;;  %v177_v38 = vld [vmem:[%s1375_s3 + $0xb0] sm:$0xff]  ;;  %v732_v40 = vpack.c.bf16 %v52_v37, %v51_v36 }
   0xa   :  { %727 = vmatpush3.bf16.msra.mxu0 %v726_v22  ;;  %v763_v39 = vpack.c.bf16 %v160_v34, %v159_v33  ;;  %v178_v41 = vld [vmem:[%s1375_s3 + $0xb8] sm:$0xff]  ;;  %v35_v42 = vld [vmem:[%s1374_s2 + $0x30] sm:$0xff]  ;;  %v53_v47 = vld [vmem:[%s1374_s2 + $0xc0] sm:$0xff] }
   0xb   :  { %760 = vmatpush3.bf16.msra.mxu1 %v759_v26  ;;  %729 = vmatprep.subr.bf16.mxu0 %v728_v27  ;;  %v36_v43 = vld [vmem:[%s1374_s2 + $0x38] sm:$0xff]  ;;  %v765_v44 = vpack.c.bf16 %v178_v41, %v177_v38  ;;  %v161_v45 = vld [vmem:[%s1375_s3 + $0x30] sm:$0xff]  ;;  %v54_v48 = vld [vmem:[%s1374_s2 + $0xc8] sm:$0xff] }
   0xc   :  { %762 = vmatprep.subr.bf16.mxu1 %v761_v31  ;;  %v162_v46 = vld [vmem:[%s1375_s3 + $0x38] sm:$0xff]  ;;  %v179_v49 = vld [vmem:[%s1375_s3 + $0xc0] sm:$0xff]  ;;  %v180_v50 = vld [vmem:[%s1375_s3 + $0xc8] sm:$0xff]  ;;  %v734_v51 = vpack.c.bf16 %v36_v43, %v35_v42  ;;  %v736_v53 = vpack.c.bf16 %v54_v48, %v53_v47 }
   0xd   :  { %v767_v52 = vpack.c.bf16 %v162_v46, %v161_v45  ;;  %v37_v54 = vld [vmem:[%s1374_s2 + $0x40] sm:$0xff]  ;;  %v38_v55 = vld [vmem:[%s1374_s2 + $0x48] sm:$0xff]  ;;  %v769_v57 = vpack.c.bf16 %v180_v50, %v179_v49  ;;  %v55_v59 = vld [vmem:[%s1374_s2 + $0xd0] sm:$0xff] }
   0xe   :  { %731 = vmatpush3.bf16.msra.mxu0 %v730_v35  ;;  %v163_v56 = vld [vmem:[%s1375_s3 + $0x40] sm:$0xff]  ;;  %v164_v58 = vld [vmem:[%s1375_s3 + $0x48] sm:$0xff]  ;;  %v56_v60 = vld [vmem:[%s1374_s2 + $0xd8] sm:$0xff]  ;;  %v738_v63 = vpack.c.bf16 %v38_v55, %v37_v54 }
   0xf   :  { %764 = vmatpush3.bf16.msra.mxu1 %v763_v39  ;;  %733 = vmatprep.subr.bf16.mxu0 %v732_v40  ;;  %v181_v61 = vld [vmem:[%s1375_s3 + $0xd0] sm:$0xff]  ;;  %v182_v62 = vld [vmem:[%s1375_s3 + $0xd8] sm:$0xff]  ;;  %v771_v0 = vpack.c.bf16 %v164_v58, %v163_v56  ;;  %v740_v1 = vpack.c.bf16 %v56_v60, %v55_v59  ;;  %v57_v7 = vld [vmem:[%s1374_s2 + $0xe0] sm:$0xff] }
  0x10   :  { %766 = vmatprep.subr.bf16.mxu1 %v765_v44  ;;  %v39_v2 = vld [vmem:[%s1374_s2 + $0x50] sm:$0xff]  ;;  %v40_v3 = vld [vmem:[%s1374_s2 + $0x58] sm:$0xff]  ;;  %v773_v5 = vpack.c.bf16 %v182_v62, %v181_v61  ;;  %v58_v8 = vld [vmem:[%s1374_s2 + $0xe8] sm:$0xff] }
  0x11   :  { %v165_v4 = vld [vmem:[%s1375_s3 + $0x50] sm:$0xff]  ;;  %v166_v6 = vld [vmem:[%s1375_s3 + $0x58] sm:$0xff]  ;;  %v183_v9 = vld [vmem:[%s1375_s3 + $0xe0] sm:$0xff]  ;;  %v742_v11 = vpack.c.bf16 %v40_v3, %v39_v2  ;;  %v744_v14 = vpack.c.bf16 %v58_v8, %v57_v7 }
  0x12   :  { %735 = vmatpush3.bf16.msra.mxu0 %v734_v51  ;;  %v184_v10 = vld [vmem:[%s1375_s3 + $0xe8] sm:$0xff]  ;;  %v41_v12 = vld [vmem:[%s1374_s2 + $0x60] sm:$0xff]  ;;  %v775_v13 = vpack.c.bf16 %v166_v6, %v165_v4  ;;  %v59_v20 = vld [vmem:[%s1374_s2 + $0xf0] sm:$0xff] }
  0x13   :  { %768 = vmatpush3.bf16.msra.mxu1 %v767_v52  ;;  %737 = vmatprep.subr.bf16.mxu0 %v736_v53  ;;  %v42_v15 = vld [vmem:[%s1374_s2 + $0x68] sm:$0xff]  ;;  %v167_v16 = vld [vmem:[%s1375_s3 + $0x60] sm:$0xff]  ;;  %v777_v18 = vpack.c.bf16 %v184_v10, %v183_v9  ;;  %v60_v21 = vld [vmem:[%s1374_s2 + $0xf8] sm:$0x3] }
  0x14   :  { %770 = vmatprep.subr.bf16.mxu1 %v769_v57  ;;  %v1061_v17 = vld [vmem:[%s1376_s0 + $0x8] sm:$0xff]  ;;  %v185_v22 = vld [vmem:[%s1375_s3 + $0xf0] sm:$0xff]  ;;  %v186_v23 = vld [vmem:[%s1375_s3 + $0xf8] sm:$0x3]  ;;  %v746_v24 = vpack.c.bf16 %v42_v15, %v41_v12  ;;  %v748_v27 = vpack.c.bf16 %v60_v21, %v59_v20 }
  0x15   :  { %v168_v19 = vld [vmem:[%s1375_s3 + $0x68] sm:$0xff]  ;;  %541 = vmatprep.mubr.msk.f32.mxu0 %vm61_vm0, %v1061_v17  ;;  %545 = vmatprep.mubr.msk.f32.mxu1 %vm61_vm0, %v1061_v17  ;;  %vm1083_vm3 = vmpackc.low %vm71_vm1, %vm857_vm2  ;;  %v43_v28 = vld [vmem:[%s1374_s2 + $0x70] sm:$0xff]  ;;  %v781_v31 = vpack.c.bf16 %v186_v23, %v185_v22 }
  0x16   :  { %739 = vmatpush3.bf16.msra.mxu0 %v738_v63  ;;  %v779_v26 = vpack.c.bf16 %v168_v19, %v167_v16  ;;  %v44_v29 = vld [vmem:[%s1374_s2 + $0x78] sm:$0xff]  ;;  %v169_v30 = vld [vmem:[%s1375_s3 + $0x70] sm:$0xff]  ;;  %v289_v33 = vld [vmem:[%s1377_s4 + $0x80] sm:$0xff] }
  0x17   :  { %772 = vmatpush3.bf16.msra.mxu1 %v771_v0  ;;  %741 = vmatprep.subr.bf16.mxu0 %v740_v1  ;;  %v170_v32 = vld [vmem:[%s1375_s3 + $0x78] sm:$0xff]  ;;  %v290_v34 = vld [vmem:[%s1377_s4 + $0x88] sm:$0xff]  ;;  %v407_v35 = vld [vmem:[%s1378_s5 + $0x80] sm:$0xff]  ;;  %v751_v37 = vpack.c.bf16 %v44_v29, %v43_v28 }
  0x18   :  { %774 = vmatprep.subr.bf16.mxu1 %v773_v5  ;;  %v408_v36 = vld [vmem:[%s1378_s5 + $0x88] sm:$0xff]  ;;  %v784_v38 = vpack.c.bf16 %v170_v32, %v169_v30  ;;  %v786_v39 = vpack.c.bf16 %v290_v34, %v289_v33  ;;  %v273_v40 = vld [vmem:[%s1377_s4] sm:$0xff]  ;;  %v291_v45 = vld [vmem:[%s1377_s4 + $0x90] sm:$0xff] }
  0x19   :  { %v274_v41 = vld [vmem:[%s1377_s4 + $0x8] sm:$0xff]  ;;  %v391_v42 = vld [vmem:[%s1378_s5] sm:$0xff]  ;;  %v819_v43 = vpack.c.bf16 %v408_v36, %v407_v35  ;;  %v292_v46 = vld [vmem:[%s1377_s4 + $0x98] sm:$0xff] }
  0x1a   :  { %743 = vmatpush3.bf16.msra.mxu0 %v742_v11  ;;  %v392_v44 = vld [vmem:[%s1378_s5 + $0x8] sm:$0xff]  ;;  %v409_v47 = vld [vmem:[%s1378_s5 + $0x90] sm:$0xff]  ;;  %v410_v48 = vld [vmem:[%s1378_s5 + $0x98] sm:$0xff]  ;;  %v788_v50 = vpack.c.bf16 %v274_v41, %v273_v40  ;;  %v790_v52 = vpack.c.bf16 %v292_v46, %v291_v45 }
  0x1b   :  { %776 = vmatpush3.bf16.msra.mxu1 %v775_v13  ;;  %745 = vmatprep.subr.bf16.mxu0 %v744_v14  ;;  %v1142_v49 = vld [vmem:[%s1376_s0] sm:$0xff]  ;;  %v821_v51 = vpack.c.bf16 %v392_v44, %v391_v42  ;;  %v275_v53 = vld [vmem:[%s1377_s4 + $0x10] sm:$0xff]  ;;  %v276_v54 = vld [vmem:[%s1377_s4 + $0x18] sm:$0xff]  ;;  %v823_v56 = vpack.c.bf16 %v410_v48, %v409_v47 }
  0x1c   :  { %778 = vmatprep.subr.bf16.mxu1 %v777_v18  ;;  %v393_v55 = vld [vmem:[%s1378_s5 + $0x10] sm:$0xff]  ;;  %v394_v57 = vld [vmem:[%s1378_s5 + $0x18] sm:$0xff]  ;;  %v293_v58 = vld [vmem:[%s1377_s4 + $0xa0] sm:$0xff]  ;;  %v792_v62 = vpack.c.bf16 %v276_v54, %v275_v53 }
  0x1d   :  { %v294_v59 = vld [vmem:[%s1377_s4 + $0xa8] sm:$0xff]  ;;  %v411_v60 = vld [vmem:[%s1378_s5 + $0xa0] sm:$0xff]  ;;  %v825_v1 = vpack.c.bf16 %v394_v57, %v393_v55  ;;  %v1185_v5 = vld [vmem:[%s1376_s0 + $0x18] sm:$0xff] }
  0x1e   :  { %747 = vmatpush3.bf16.msra.mxu0 %v746_v24  ;;  %v412_v61 = vld [vmem:[%s1378_s5 + $0xa8] sm:$0xff]  ;;  %v277_v63 = vld [vmem:[%s1377_s4 + $0x20] sm:$0xff]  ;;  %v794_v2 = vpack.c.bf16 %v294_v59, %v293_v58  ;;  %v295_v7 = vld [vmem:[%s1377_s4 + $0xb0] sm:$0xff] }
  0x1f   :  { %780 = vmatpush3.bf16.msra.mxu1 %v779_v26  ;;  %750 = vmatprep.subr.msk.bf16.mxu0 %vm1083_vm3, %v748_v27  ;;  %v278_v0 = vld [vmem:[%s1377_s4 + $0x28] sm:$0xff]  ;;  %v395_v3 = vld [vmem:[%s1378_s5 + $0x20] sm:$0xff]  ;;  %v827_v6 = vpack.c.bf16 %v412_v61, %v411_v60  ;;  %v296_v8 = vld [vmem:[%s1377_s4 + $0xb8] sm:$0xff] }
  0x20   :  { %783 = vmatprep.subr.msk.bf16.mxu1 %vm1083_vm3, %v781_v31  ;;  %v396_v4 = vld [vmem:[%s1378_s5 + $0x28] sm:$0xff]  ;;  %v1198_v9 = vld [vmem:[%s1376_s0 + $0x10] sm:$0xff]  ;;  %v414_v11 = vld [vmem:[%s1378_s5 + $0xb8] sm:$0xff]  ;;  %v796_v12 = vpack.c.bf16 %v278_v0, %v277_v63  ;;  %v798_v16 = vpack.c.bf16 %v296_v8, %v295_v7 }
  0x21   :  { %v413_v10 = vld [vmem:[%s1378_s5 + $0xb0] sm:$0xff]  ;;  %v280_v14 = vld [vmem:[%s1377_s4 + $0x38] sm:$0xff]  ;;  %v829_v15 = vpack.c.bf16 %v396_v4, %v395_v3  ;;  %v1225_v20 = vld [vmem:[%s1376_s0 + $0x28] sm:$0xf] }
  0x22   :  { %752 = vmatpush3.bf16.msra.mxu0 %v751_v37  ;;  %v279_v13 = vld [vmem:[%s1377_s4 + $0x30] sm:$0xff]  ;;  %v398_v19 = vld [vmem:[%s1378_s5 + $0x38] sm:$0xff]  ;;  %v831_v21 = vpack.c.bf16 %v414_v11, %v413_v10  ;;  %v297_v22 = vld [vmem:[%s1377_s4 + $0xc0] sm:$0xff] }
  0x23   :  { %785 = vmatpush3.bf16.msra.mxu1 %v784_v38  ;;  %787 = vmatprep.subr.bf16.mxu0 %v786_v39  ;;  %v397_v18 = vld [vmem:[%s1378_s5 + $0x30] sm:$0xff]  ;;  %v298_v23 = vld [vmem:[%s1377_s4 + $0xc8] sm:$0xff]  ;;  %v1238_v24 = vld [vmem:[%s1376_s0 + $0x20] sm:$0xf]  ;;  %v800_v28 = vpack.c.bf16 %v280_v14, %v279_v13 }
  0x24   :  { %820 = vmatprep.subr.bf16.mxu1 %v819_v43  ;;  %v415_v26 = vld [vmem:[%s1378_s5 + $0xc0] sm:$0xff]  ;;  %v416_v27 = vld [vmem:[%s1378_s5 + $0xc8] sm:$0xff]  ;;  %v833_v31 = vpack.c.bf16 %v398_v19, %v397_v18  ;;  %v802_v32 = vpack.c.bf16 %v298_v23, %v297_v22  ;;  %v511_v35 = vld [vmem:[%s1379_s1 + $0x10] sm:$0xf] }
  0x25   :  { %140 = vmatmul.mubr.f32.vlgmr.msra.gmra.mrb[0].mxu0 %v1142_v49  ;;  %v281_v29 = vld [vmem:[%s1377_s4 + $0x40] sm:$0xff]  ;;  %v282_v30 = vld [vmem:[%s1377_s4 + $0x48] sm:$0xff]  ;;  %v835_v36 = vpack.c.bf16 %v416_v27, %v415_v26  ;;  %v299_v38 = vld [vmem:[%s1377_s4 + $0xd0] sm:$0xff]  ;;  %524 = vperm.xlu1 %855, %v511_v35  }
  0x26   :  { %255 = vmatmul.mubr.f32.vlgmr.msra.gmra.mrb[0].mxu1 %v1142_v49  ;;  %789 = vmatpush3.bf16.msra.mxu0 %v788_v50  ;;  %v399_v33 = vld [vmem:[%s1378_s5 + $0x40] sm:$0xff]  ;;  %v400_v37 = vld [vmem:[%s1378_s5 + $0x48] sm:$0xff]  ;;  %v300_v39 = vld [vmem:[%s1377_s4 + $0xd8] sm:$0xff]  ;;  %v804_v42 = vpack.c.bf16 %v282_v30, %v281_v29 }
  0x27   :  { %822 = vmatpush3.bf16.msra.mxu1 %v821_v51  ;;  %791 = vmatprep.subr.bf16.mxu0 %v790_v52  ;;  %v509_v34 = vld [vmem:[%s1379_s1] sm:$0xff]  ;;  %v417_v40 = vld [vmem:[%s1378_s5 + $0xd0] sm:$0xff]  ;;  %v418_v41 = vld [vmem:[%s1378_s5 + $0xd8] sm:$0xff]  ;;  %v837_v44 = vpack.c.bf16 %v400_v37, %v399_v33  ;;  %v806_v45 = vpack.c.bf16 %v300_v39, %v299_v38 }
  0x28   :  { %824 = vmatprep.subr.bf16.mxu1 %v823_v56  ;;  %542 = vmatprep.mubr.msk.f32.mxu0 %vm61_vm0, %v1185_v5  ;;  %v510_v43 = vld [vmem:[%s1379_s1 + $0x8] sm:$0xff]  ;;  %v283_v46 = vld [vmem:[%s1377_s4 + $0x50] sm:$0xff]  ;;  %v839_v48 = vpack.c.bf16 %v418_v41, %v417_v40  ;;  %v402_v50 = vld [vmem:[%s1378_s5 + $0x58] sm:$0xff] }
  0x29   :  { %546 = vmatprep.mubr.msk.f32.mxu1 %vm61_vm0, %v1185_v5  ;;  %145 = vmatmul.mubr.f32.gmra.mrb[2].mxu0 %v1198_v9  ;;  %v401_v47 = vld [vmem:[%s1378_s5 + $0x50] sm:$0xff]  ;;  %v301_v51 = vld [vmem:[%s1377_s4 + $0xe0] sm:$0xff]  ;;  %v302_v52 = vld [vmem:[%s1377_s4 + $0xe8] sm:$0xff] }
  0x2a   :  { %793 = vmatpush3.bf16.msra.mxu0 %v792_v62  ;;  %260 = vmatmul.mubr.f32.gmra.mrb[2].mxu1 %v1198_v9  ;;  %v419_v53 = vld [vmem:[%s1378_s5 + $0xe0] sm:$0xff]  ;;  %v420_v54 = vld [vmem:[%s1378_s5 + $0xe8] sm:$0xff]  ;;  %v841_v56 = vpack.c.bf16 %v402_v50, %v401_v47  ;;  %v810_v57 = vpack.c.bf16 %v302_v52, %v301_v51  ;;  %v303_v63 = vld [vmem:[%s1377_s4 + $0xf0] sm:$0xff] }
  0x2b   :  { %826 = vmatpush3.bf16.msra.mxu1 %v825_v1  ;;  %795 = vmatprep.subr.bf16.mxu0 %v794_v2  ;;  %v285_v58 = vld [vmem:[%s1377_s4 + $0x60] sm:$0xff]  ;;  %v286_v59 = vld [vmem:[%s1377_s4 + $0x68] sm:$0xff]  ;;  %v843_v61 = vpack.c.bf16 %v420_v54, %v419_v53  ;;  %v304_v0 = vld [vmem:[%s1377_s4 + $0xf8] sm:$0x3] }
  0x2c   :  { %828 = vmatprep.subr.bf16.mxu1 %v827_v6  ;;  %543 = vmatprep.mubr.msk.f32.mxu0 %vm61_vm0, %v1225_v20  ;;  %v403_v60 = vld [vmem:[%s1378_s5 + $0x60] sm:$0xff]  ;;  %v404_v62 = vld [vmem:[%s1378_s5 + $0x68] sm:$0xff]  ;;  %v421_v1 = vld [vmem:[%s1378_s5 + $0xf0] sm:$0xff]  ;;  %v812_v3 = vpack.c.bf16 %v286_v59, %v285_v58  ;;  %v814_v6 = vpack.c.bf16 %v304_v0, %v303_v63 }
  0x2d   :  { %547 = vmatprep.mubr.msk.f32.mxu1 %vm61_vm0, %v1225_v20  ;;  %150 = vmatmul.mubr.f32.gmra.mrb[4].mxu0 %v1238_v24  ;;  %v422_v2 = vld [vmem:[%s1378_s5 + $0xf8] sm:$0x3]  ;;  %v845_v4 = vpack.c.bf16 %v404_v62, %v403_v60  ;;  %v287_v7 = vld [vmem:[%s1377_s4 + $0x70] sm:$0xff] }
  0x2e   :  { %797 = vmatpush3.bf16.msra.mxu0 %v796_v12  ;;  %265 = vmatmul.mubr.f32.gmra.mrb[4].mxu1 %v1238_v24  ;;  %v288_v8 = vld [vmem:[%s1377_s4 + $0x78] sm:$0xff]  ;;  %v847_v10 = vpack.c.bf16 %v422_v2, %v421_v1  ;;  %v405_v11 = vld [vmem:[%s1378_s5 + $0x70] sm:$0xff] }
  0x2f   :  { %830 = vmatpush3.bf16.msra.mxu1 %v829_v15  ;;  %799 = vmatprep.subr.bf16.mxu0 %v798_v16  ;;  %v406_v12 = vld [vmem:[%s1378_s5 + $0x78] sm:$0xff]  ;;  %v817_v13 = vpack.c.bf16 %v288_v8, %v287_v7 }
  0x30   :  { %832 = vmatprep.subr.bf16.mxu1 %v831_v21  ;;  %549 = vmatprep.mubr.msk.f32.mxu0 %vm61_vm0, %v1061_v17  ;;  %v850_v14 = vpack.c.bf16 %v406_v12, %v405_v11 }
  0x31   :  { %553 = vmatprep.mubr.msk.f32.mxu1 %vm61_vm0, %v1061_v17  ;;  %514 = vperm.xlu0 %854, %v509_v34   ;;  %v284_v17 = vld [vmem:[%s1377_s4 + $0x58] sm:$0xff] }
  0x32   :  { %801 = vmatpush3.bf16.msra.mxu0 %v800_v28  ;;  %v808_v55 = vpack.c.bf16 %v284_v17, %v283_v46 }
  0x33   :  { %834 = vmatpush3.bf16.msra.mxu1 %v833_v31  ;;  %803 = vmatprep.subr.bf16.mxu0 %v802_v32 }
  0x34   :  { %836 = vmatprep.subr.bf16.mxu1 %v835_v36 }
  0x35   :  { %519 = vperm.xlu0 %854, %v510_v43  }
  0x36   :  { %805 = vmatpush3.bf16.msra.mxu0 %v804_v42 }
  0x37   :  { %838 = vmatpush3.bf16.msra.mxu1 %v837_v44  ;;  %807 = vmatprep.subr.bf16.mxu0 %v806_v45 }
  0x38   :  { %840 = vmatprep.subr.bf16.mxu1 %v839_v48 }
  0x3a   :  { %809 = vmatpush3.bf16.msra.mxu0 %v808_v55 }
  0x3b   :  { %842 = vmatpush3.bf16.msra.mxu1 %v841_v56  ;;  %811 = vmatprep.subr.bf16.mxu0 %v810_v57 }
  0x3c   :  { %844 = vmatprep.subr.bf16.mxu1 %v843_v61 }
  0x3e   :  { %813 = vmatpush3.bf16.msra.mxu0 %v812_v3 }
  0x3f   :  { %846 = vmatpush3.bf16.msra.mxu1 %v845_v4  ;;  %816 = vmatprep.subr.msk.bf16.mxu0 %vm1083_vm3, %v814_v6 }
  0x40   :  { %849 = vmatprep.subr.msk.bf16.mxu1 %vm1083_vm3, %v847_v10 }
  0x42   :  { %818 = vmatpush3.bf16.msra.mxu0 %v817_v13 }
  0x43   :  { %851 = vmatpush3.bf16.msra.mxu1 %v850_v14 }
  0x45   :  { %373 = vmatmul.mubr.f32.vlgmr.msra.gmra.mrb[6].mxu0 %v1142_v49 }
  0x46   :  { %491 = vmatmul.mubr.f32.vlgmr.msra.gmra.mrb[6].mxu1 %v1142_v49  ;;  %550 = vmatprep.mubr.msk.f32.mxu0 %vm61_vm0, %v1185_v5 }
  0x47   :  { %554 = vmatprep.mubr.msk.f32.mxu1 %vm61_vm0, %v1185_v5 }
  0x49   :  { %378 = vmatmul.mubr.f32.gmra.mrb[8].mxu0 %v1198_v9 }
  0x4a   :  { %496 = vmatmul.mubr.f32.gmra.mrb[8].mxu1 %v1198_v9  ;;  %551 = vmatprep.mubr.msk.f32.mxu0 %vm61_vm0, %v1225_v20 }
  0x4b   :  { %555 = vmatprep.mubr.msk.f32.mxu1 %vm61_vm0, %v1225_v20 }
  0x4d   :  { %383 = vmatmul.mubr.f32.gmra.mrb[10].mxu0 %v1238_v24 }
  0x4e   :  { %501 = vmatmul.mubr.f32.gmra.mrb[10].mxu1 %v1238_v24 }
  0xa4   :  { %v525_v62 = vpop.permute.xlu1 %524 }
  0xb0   :  { %v515_v39 = vpop.permute.xlu0 %514 }
  0xb4   :  { %v520_v52 = vpop.permute.xlu0 %519 }
  0xf8   :  { %v588_v25 = vpop.f32.mrb[0].mxu0 }
  0xf9   :  { %v629_v49 = vpop.f32.mrb[0].mxu1  ;;  %v589_v15 = vpop.f32.mrb[1].mxu0 }
  0xfa   :  { %v590_v16 = vadd.f32 %v589_v15, %v588_v25  ;;  %v630_v18 = vpop.f32.mrb[1].mxu1 }
  0xfb   :  { %v631_v5 = vadd.f32 %v630_v18, %v629_v49 }
  0xfc   :  { %v591_v19 = vpop.f32.mrb[2].mxu0 }
  0xfd   :  { %v270_v21 = vmax.f32 %v590_v16, %v631_v5  ;;  %v632_v22 = vpop.f32.mrb[2].mxu1  ;;  %v592_v9 = vpop.f32.mrb[3].mxu0 }
  0xfe   :  { %v593_v23 = vadd.f32 %v592_v9, %v591_v19  ;;  %v633_v26 = vpop.f32.mrb[3].mxu1 }
  0xff   :  { %v634_v27 = vadd.f32 %v633_v26, %v632_v22 }
 0x100   :  { %v594_v28 = vpop.f32.mrb[4].mxu0 }
 0x101   :  { %v271_v29 = vmax.f32 %v593_v23, %v634_v27  ;;  %v635_v20 = vpop.f32.mrb[4].mxu1  ;;  %v595_v30 = vpop.f32.mrb[5].mxu0 }
 0x102   :  { %v596_v31 = vadd.f32 %v595_v30, %v594_v28  ;;  %v636_v32 = vpop.f32.mrb[5].mxu1 }
 0x103   :  { %v637_v24 = vadd.f32 %v636_v32, %v635_v20 }
 0x105   :  { %v272_v33 = vmax.f32 %v596_v31, %v637_v24 }
 0x118   :  { %v670_v34 = vpop.f32.mrb[6].mxu0 }
 0x119   :  { %v671_v35 = vpop.f32.mrb[7].mxu0  ;;  %v711_v36 = vpop.f32.mrb[6].mxu1 }
 0x11a   :  { %v672_v37 = vadd.f32 %v671_v35, %v670_v34  ;;  %v712_v38 = vpop.f32.mrb[7].mxu1 }
 0x11b   :  { %v713_v40 = vadd.f32 %v712_v38, %v711_v36 }
 0x11c   :  { %v388_v41 = vmax.f32 %v270_v21, %v672_v37  ;;  %v673_v42 = vpop.f32.mrb[8].mxu0 }
 0x11d   :  { %v674_v43 = vpop.f32.mrb[9].mxu0  ;;  %v714_v44 = vpop.f32.mrb[8].mxu1 }
 0x11e   :  { %v675_v45 = vadd.f32 %v674_v43, %v673_v42  ;;  %v715_v46 = vpop.f32.mrb[9].mxu1  ;;  %v506_v17 = vmax.f32 %v388_v41, %v713_v40 }
 0x11f   :  { %v716_v47 = vadd.f32 %v715_v46, %v714_v44 }
 0x120   :  { %v389_v48 = vmax.f32 %v271_v29, %v675_v45  ;;  %v527_v50 = vadd.f32 %v515_v39, %v506_v17  ;;  %v676_v51 = vpop.f32.mrb[10].mxu0 }
 0x121   :  { %v677_v53 = vpop.f32.mrb[11].mxu0  ;;  %v717_v54 = vpop.f32.mrb[10].mxu1 }
 0x122   :  { %v530_v55 = vmax.f32 %v527_v50, 0.0  ;;  %v678_v56 = vadd.f32 %v677_v53, %v676_v51  ;;  %v718_v57 = vpop.f32.mrb[11].mxu1  ;;  %v507_v58 = vmax.f32 %v389_v48, %v716_v47 }
 0x123   :  { %v719_v59 = vadd.f32 %v718_v57, %v717_v54 }
 0x124   :  { %533 = vst [vmem:[%s1380_s6] sm:$0xff] %v530_v55  ;;  %v390_v60 = vmax.f32 %v272_v33, %v678_v56  ;;  %v528_v61 = vadd.f32 %v520_v52, %v507_v58 }
 0x126   :  { %v531_v63 = vmax.f32 %v528_v61, 0.0  ;;  %v508_v0 = vmax.f32 %v390_v60, %v719_v59 }
 0x128   :  { %534 = vst [vmem:[%s1380_s6 + $0x8] sm:$0xff] %v531_v63  ;;  %v529_v1 = vadd.f32 %v525_v62, %v508_v0 }
 0x12a   :  { %v532_v2 = vmax.f32 %v529_v1, 0.0 }
 0x12c   :  { %535 = vst [vmem:[%s1380_s6 + $0x10] sm:$0xf] %v532_v2 }

// kernel: net_forward.5
= control target key start
LH: loop header
LB: loop body
LE: loop exit
PB: predicated region body
PF: predicated region fallthrough
CT: control target
= control target key end

     0   :  { %v478_v3 = vmov 0.0|0.0   ;;  %vm479_vm0 = vmmov 0   ;;  %v480_v4 = vmov 0.0   ;;  %vm70_vm1 = vcmask 523264   ;;  %s685_s1 = inlined_call_operand.vmem [shape: f32[320,50], index: 1, kind: input, shape index: {}]   ;;  %s686_s0 = inlined_call_operand.vmem [shape: f32[8,320], index: 0, kind: input, shape index: {}]   ;;  %s687_s3 = inlined_call_operand.vmem [shape: f32[50,10], index: 3, kind: input, shape index: {}]   ;;  %s688_s2 = inlined_call_operand.vmem [shape: f32[1,50], index: 2, kind: input, shape index: {}]   ;;  %s689_s4 = inlined_call_operand.vmem [shape: f32[1,10], index: 4, kind: input, shape index: {}]   ;;  %s690_s5 = inlined_call_operand.vmem [shape: f32[8,10], index: 5, kind: output, shape index: {}]  }
   0x1   :  { %v39_v0 = vld [vmem:[%s685_s1 + $0x80] sm:$0xff]  ;;  %v40_v1 = vld [vmem:[%s685_s1 + $0x88] sm:$0xff]  ;;  %450 = vmatprep.subr.bf16.mxu1 %v478_v3  ;;  %398 = vmatprep.mubr.msk.f32.mxu1 %vm479_vm0, %v480_v4  ;;  %v41_v7 = vld [vmem:[%s685_s1 + $0x90] sm:$0xff]  ;;  %vm233_vm2 = vcmask 1041408   ;;  %vm229_vm3 = vcmask 408576   ;;  %vm307_vm4 = vcmask 80896  }
   0x2   :  { %v23_v2 = vld [vmem:[%s685_s1] sm:$0xff]  ;;  %v418_v5 = vpack.c.bf16 %v40_v1, %v39_v0  ;;  %v24_v6 = vld [vmem:[%s685_s1 + $0x8] sm:$0xff]  ;;  %v42_v8 = vld [vmem:[%s685_s1 + $0x98] sm:$0xff] }
   0x3   :  { %v420_v9 = vpack.c.bf16 %v24_v6, %v23_v2  ;;  %v422_v10 = vpack.c.bf16 %v42_v8, %v41_v7  ;;  %v25_v11 = vld [vmem:[%s685_s1 + $0x10] sm:$0xff]  ;;  %v26_v12 = vld [vmem:[%s685_s1 + $0x18] sm:$0xff]  ;;  %v43_v13 = vld [vmem:[%s685_s1 + $0xa0] sm:$0xff] }
   0x4   :  { %419 = vmatprep.subr.bf16.mxu0 %v418_v5  ;;  %v44_v14 = vld [vmem:[%s685_s1 + $0xa8] sm:$0xff]  ;;  %v424_v15 = vpack.c.bf16 %v26_v12, %v25_v11  ;;  %v27_v17 = vld [vmem:[%s685_s1 + $0x20] sm:$0xff]  ;;  %v45_v19 = vld [vmem:[%s685_s1 + $0xb0] sm:$0xff] }
   0x5   :  { %421 = vmatpush3.bf16.msra.mxu0 %v420_v9  ;;  %v426_v16 = vpack.c.bf16 %v44_v14, %v43_v13  ;;  %v28_v18 = vld [vmem:[%s685_s1 + $0x28] sm:$0xff]  ;;  %v46_v20 = vld [vmem:[%s685_s1 + $0xb8] sm:$0xff]  ;;  %v55_v22 = vld [vmem:[%s685_s1 + $0x100] sm:$0xff] }
   0x6   :  { %423 = vmatprep.subr.bf16.mxu0 %v422_v10  ;;  %v428_v21 = vpack.c.bf16 %v28_v18, %v27_v17  ;;  %v56_v23 = vld [vmem:[%s685_s1 + $0x108] sm:$0xff]  ;;  %v430_v24 = vpack.c.bf16 %v46_v20, %v45_v19  ;;  %v29_v25 = vld [vmem:[%s685_s1 + $0x30] sm:$0xff]  ;;  %v30_v26 = vld [vmem:[%s685_s1 + $0x38] sm:$0xff] }
   0x7   :  { %v47_v27 = vld [vmem:[%s685_s1 + $0xc0] sm:$0xff]  ;;  %v451_v28 = vpack.c.bf16 %v56_v23, %v55_v22  ;;  %v48_v29 = vld [vmem:[%s685_s1 + $0xc8] sm:$0xff]  ;;  %v57_v30 = vld [vmem:[%s685_s1 + $0x110] sm:$0xff]  ;;  %v432_v33 = vpack.c.bf16 %v30_v26, %v29_v25 }
   0x8   :  { %v58_v31 = vld [vmem:[%s685_s1 + $0x118] sm:$0xff]  ;;  %v59_v34 = vld [vmem:[%s685_s1 + $0x120] sm:$0xff]  ;;  %v60_v35 = vld [vmem:[%s685_s1 + $0x128] sm:$0xff]  ;;  %v434_v37 = vpack.c.bf16 %v48_v29, %v47_v27 }
   0x9   :  { %425 = vmatpush3.bf16.msra.mxu0 %v424_v15  ;;  %452 = vmatpush3.bf16.msra.mxu1 %v451_v28  ;;  %v454_v32 = vpack.c.bf16 %v58_v31, %v57_v30  ;;  %v21_v36 = vld [vmem:[%s686_s0 + $0x8] sm:$0xff]  ;;  %v31_v38 = vld [vmem:[%s685_s1 + $0x40] sm:$0xff]  ;;  %v49_v40 = vld [vmem:[%s685_s1 + $0xd0] sm:$0xff]  ;;  %v457_v42 = vpack.c.bf16 %v60_v35, %v59_v34 }
   0xa   :  { %427 = vmatprep.subr.bf16.mxu0 %v426_v16  ;;  %453 = vmatprep.subr.bf16.mxu1 %v478_v3  ;;  %v32_v39 = vld [vmem:[%s685_s1 + $0x48] sm:$0xff]  ;;  %v50_v41 = vld [vmem:[%s685_s1 + $0xd8] sm:$0xff]  ;;  %v61_v44 = vld [vmem:[%s685_s1 + $0x130] sm:$0xff] }
   0xb   :  { %138 = vmatprep.mubr.f32.mxu0 %v21_v36  ;;  %v436_v43 = vpack.c.bf16 %v32_v39, %v31_v38  ;;  %v62_v45 = vld [vmem:[%s685_s1 + $0x138] sm:$0xff]  ;;  %v438_v46 = vpack.c.bf16 %v50_v41, %v49_v40  ;;  %v33_v47 = vld [vmem:[%s685_s1 + $0x50] sm:$0xff]  ;;  %v51_v49 = vld [vmem:[%s685_s1 + $0xe0] sm:$0xff] }
   0xc   :  { %v34_v48 = vld [vmem:[%s685_s1 + $0x58] sm:$0xff]  ;;  %v52_v50 = vld [vmem:[%s685_s1 + $0xe8] sm:$0xff]  ;;  %v460_v51 = vpack.c.bf16 %v62_v45, %v61_v44  ;;  %v215_v53 = vld [vmem:[%s687_s3] sm:$0xff] }
   0xd   :  { %429 = vmatpush3.bf16.msra.mxu0 %v428_v21  ;;  %455 = vmatpush3.bf16.msra.mxu1 %v454_v32  ;;  %v440_v52 = vpack.c.bf16 %v34_v48, %v33_v47  ;;  %v216_v54 = vld [vmem:[%s687_s3 + $0x8] sm:$0xff]  ;;  %v442_v55 = vpack.c.bf16 %v52_v50, %v51_v49  ;;  %v35_v56 = vld [vmem:[%s685_s1 + $0x60] sm:$0xff]  ;;  %v53_v58 = vld [vmem:[%s685_s1 + $0xf0] sm:$0xff] }
   0xe   :  { %431 = vmatprep.subr.bf16.mxu0 %v430_v24  ;;  %456 = vmatprep.subr.bf16.mxu1 %v478_v3  ;;  %v36_v57 = vld [vmem:[%s685_s1 + $0x68] sm:$0xff]  ;;  %v54_v59 = vld [vmem:[%s685_s1 + $0xf8] sm:$0xff]  ;;  %v22_v60 = vld [vmem:[%s686_s0 + $0x10] sm:$0xff]  ;;  %v463_v61 = vpack.c.bf16 %v216_v54, %v215_v53 }
   0xf   :  { %v444_v62 = vpack.c.bf16 %v36_v57, %v35_v56  ;;  %v446_v63 = vpack.c.bf16 %v54_v59, %v53_v58  ;;  %v37_v0 = vld [vmem:[%s685_s1 + $0x70] sm:$0xff]  ;;  %v38_v1 = vld [vmem:[%s685_s1 + $0x78] sm:$0xff]  ;;  %v20_v5 = vld [vmem:[%s686_s0] sm:$0xff] }
  0x10   :  { %v448_v2 = vpack.c.bf16 %v38_v1, %v37_v0  ;;  %v217_v6 = vld [vmem:[%s687_s3 + $0x10] sm:$0xff]  ;;  %v218_v7 = vld [vmem:[%s687_s3 + $0x18] sm:$0xff]  ;;  %v219_v9 = vld [vmem:[%s687_s3 + $0x20] sm:$0xff] }
  0x11   :  { %433 = vmatpush3.bf16.msra.mxu0 %v432_v33  ;;  %458 = vmatpush3.bf16.msra.mxu1 %v457_v42  ;;  %v466_v8 = vpack.c.bf16 %v218_v7, %v217_v6  ;;  %v220_v10 = vld [vmem:[%s687_s3 + $0x28] sm:$0xff]  ;;  %v221_v12 = vld [vmem:[%s687_s3 + $0x30] sm:$0x3]  ;;  %v325_v16 = vld [vmem:[%s688_s2] ss:$0 sm:$0xff] }
  0x12   :  { %435 = vmatprep.subr.bf16.mxu0 %v434_v37  ;;  %459 = vmatprep.subr.bf16.mxu1 %v478_v3  ;;  %v469_v11 = vpack.c.bf16 %v220_v10, %v219_v9 }
  0x15   :  { %437 = vmatpush3.bf16.msra.mxu0 %v436_v43  ;;  %461 = vmatpush3.bf16.msra.mxu1 %v460_v51 }
  0x16   :  { %439 = vmatprep.subr.bf16.mxu0 %v438_v46  ;;  %462 = vmatprep.subr.bf16.mxu1 %v478_v3 }
  0x18   :  { %399 = vmatmul.mubr.msk.f32.vlgmr.msra.gmra.mrb[0].mxu1 %vm70_vm1, %v22_v60 }
  0x19   :  { %441 = vmatpush3.bf16.msra.mxu0 %v440_v52  ;;  %464 = vmatpush3.bf16.msra.mxu1 %v463_v61 }
  0x1a   :  { %443 = vmatprep.subr.bf16.mxu0 %v442_v55  ;;  %415 = vmatprep.mubr.msk.f32.mxu1 %vm479_vm0, %v480_v4 }
  0x1b   :  { %465 = vmatprep.subr.bf16.mxu1 %v478_v3 }
  0x1d   :  { %445 = vmatpush3.bf16.msra.mxu0 %v444_v62  ;;  %467 = vmatpush3.bf16.msra.mxu1 %v466_v8 }
  0x1e   :  { %447 = vmatprep.subr.bf16.mxu0 %v446_v63  ;;  %468 = vmatprep.subr.bf16.mxu1 %v478_v3 }
  0x21   :  { %449 = vmatpush3.bf16.msra.mxu0 %v448_v2  ;;  %470 = vmatpush3.bf16.msra.mxu1 %v469_v11 }
  0x22   :  { %413 = vmatprep.subr.mxu1 %v480_v4  ;;  %v327_v4 = vld [vmem:[%s689_s4] ss:$0 sm:$0xff] }
  0x24   :  { %139 = vmatmul.mubr.f32.vlgmr.msra.gmra.mrb[0].mxu0 %v20_v5 }
  0x25   :  { %414 = vmatpush3.msk.msra.mxu1 %vm233_vm2, %v221_v12 }
  0xeb   :  { %v210_v13 = vpop.f32.mrb[0].mxu1 }
  0xec   :  { %v400_v3 = vpop.f32.mrb[1].mxu1 }
  0xf7   :  { %v362_v14 = vpop.f32.mrb[0].mxu0 }
  0xf8   :  { %v363_v15 = vpop.f32.mrb[1].mxu0 }
  0xf9   :  { %v364_v17 = vadd.f32 %v363_v15, %v362_v14 }
  0xfb   :  { %v141_v18 = vadd.f32 %v364_v17, %v325_v16 }
  0xfd   :  { %v211_v19 = vadd.f32 %v210_v13, %v141_v18 }
  0xff   :  { %v214_v20 = vmax.f32 %v211_v19, 0.0 }
 0x101   :  { %416 = vmatmul.mubr.msk.f32.vlgmr.msra.gmra.mrb[2].mxu1 %vm229_vm3, %v214_v20 }
 0x1d4   :  { %v303_v21 = vpop.f32.mrb[2].mxu1 }
 0x1d5   :  { %v304_v22 = vadd.f32 %v327_v4, %v303_v21  ;;  %v417_v23 = vpop.f32.mrb[3].mxu1 }
 0x1d7   :  { %v308_v24 = vsel %vm307_vm4, %v304_v22, -inf }
 0x1d8   :  { %309 = vmax.xlane.f32.xlu0 %v308_v24 }
 0x265   :  { %v310_v25 = vpop.xlane.xlu0 %309 }
 0x266   :  { %v311_v26 = vsub.f32 %v304_v22, %v310_v25 }
 0x268   :  { %v312_v27 = vmul.f32 1.442695, %v311_v26 }
 0x26a   :  { %474 = vpow2.f32 %v312_v27 }
 0x274   :  { %v475_v28 = vpop.eup %474 }
 0x275   :  { %v314_v29 = vsel %vm307_vm4, %v475_v28, 0.0 }
 0x276   :  { %315 = vadd.xlane.f32.xlu0 %v314_v29 }
 0x303   :  { %v316_v30 = vpop.xlane.xlu0 %315 }
 0x304   :  { %476 = vlog2.f32 %v316_v30 }
 0x30e   :  { %v477_v31 = vpop.eup %476 }
 0x30f   :  { %v318_v32 = vmul.f32 0.6931472, %v477_v31 }
 0x311   :  { %v319_v33 = vsub.f32 %v311_v26, %v318_v32 }
 0x313   :  { %320 = vst.msk [vmem:[%s690_s5] sm:$0xff] %vm307_vm4, %v319_v33 }

</bundles_post_ra>
